<compile_context>
chip_gen: v7x
topology: tpu7x:2x2x1
jax: 0.10.0
libtpu: 0.0.40
codegen_flags: <defaults>
</compile_context>

<pallas_src>
import jax
import jax.numpy as jnp
import numpy as np
from jax.experimental import pallas as pl
from jax.experimental.pallas import tpu as pltpu

# ---- small, module-consistent hyperparameters -------------------------------
B = 4            # batch
BP = 8           # batch padded to a full sublane group
P = 16           # args.window
M = 8            # data.m (number of series)
HIDC = 32        # args.hidCNN == hidR
CK = 6           # args.CNN_kernel
T = P - CK + 1   # conv_out_dim = 11
TM1 = T - 1      # number of LSTM steps actually run = 10
CKM = CK * M     # flattened conv receptive field = 48


# ---- Pallas kernel -----------------------------------------------------------
def lstnet_attn_kernel(xcol_ref, convw_ref, convb_ref,
                       wih_ref, whh_ref, wcat_ref, bias_ref,
                       attw_ref, attb_ref,
                       linw_ref, linb_ref,
                       h0_ref, c0_ref,
                       res_ref):
    H = h0_ref.shape[1]

    # ---- hoisted, time-parallel matmuls (off the serial chain) ---------------
    # conv_all: (TM1*BP, H) = relu(im2col @ W_conv + b_conv)
    conv_all = jnp.maximum(
        jnp.dot(xcol_ref[...], convw_ref[...],
                preferred_element_type=jnp.float32) + convb_ref[...],
        0.0)
    # TODO(synk): dropout is treated as identity (eval mode).
    # xproj_all: (TM1*BP, 4H), LSTM bias folded in once.
    xproj_all = jnp.dot(conv_all.astype(jnp.bfloat16), wih_ref[...],
                        preferred_element_type=jnp.float32) + bias_ref[...]

    whh = whh_ref[...]            # (H, 4H) bf16
    bias = bias_ref[...]          # (1, 4H) f32
    attw = attw_ref[...]          # (1, H)  f32
    attb = attb_ref[...]          # (1, 1)  f32

    def gates_to_hc(gates, c):
        # 2 EUP pushes: activate the full (BP, 4H) vreg, then take lane slices.
        sig = jax.nn.sigmoid(gates)
        tnh = jnp.tanh(gates)
        i_g = sig[:, 0 * H:1 * H]
        f_g = sig[:, 1 * H:2 * H]
        g_g = tnh[:, 2 * H:3 * H]
        o_g = sig[:, 3 * H:4 * H]
        c_new = f_g * c + i_g * g_g
        h_new = o_g * jnp.tanh(c_new)
        return h_new, c_new

    # ---- fully unrolled recurrence (TM1 is a static constant) ----------------
    h = h0_ref[...]
    c = c0_ref[...]
    h_list = []
    score_list = []
    for i in range(TM1):
        xp = xproj_all[i * BP:(i + 1) * BP, :]            # static 8-row slice
        gates = xp + jnp.dot(h.astype(jnp.bfloat16), whh,
                             preferred_element_type=jnp.float32)
        h, c = gates_to_hc(gates, c)
        h_list.append(h)
        # attention score for this timestep: lane reduction over H -> (BP, 1)
        score_list.append(jnp.sum(h * attw, axis=-1, keepdims=True) + attb)

    # ---- attention softmax over time, on (BP, 1) lane tiles -------------------
    m = score_list[0]
    for s in score_list[1:]:
        m = jnp.maximum(m, s)
    exp_list = [jnp.exp(s - m) for s in score_list]
    denom = exp_list[0]
    for e in exp_list[1:]:
        denom = denom + e
    inv = 1.0 / denom
    attn_out = jnp.zeros_like(h)
    for i in range(TM1):
        attn_out = attn_out + h_list[i] * (exp_list[i] * inv)

    # ---- extra LSTM step on (attn_out + last h), fused [W_ih; W_hh] matmul ----
    combined = attn_out + h
    xcat = jnp.concatenate([combined, h], axis=-1).astype(jnp.bfloat16)  # (BP, 2H)
    gates = jnp.dot(xcat, wcat_ref[...],
                    preferred_element_type=jnp.float32) + bias
    out_h, _ = gates_to_hc(gates, c)

    # ---- final Linear(hidR -> m) ----------------------------------------------
    res = jnp.dot(out_h.astype(jnp.bfloat16), linw_ref[...],
                  preferred_element_type=jnp.float32) + linb_ref[...]
    res_ref[...] = res.astype(res_ref.dtype)


# ---- wrapper -----------------------------------------------------------------
def lstnet_attention_forward(x, params, h0, c0):
    (convw_bf, conv_b, wih_bf, whh_bf, wcat_bf, b_lstm,
     att_w, att_b, linw_bf, lin_b) = params

    # im2col (glue): only the TM1 timesteps the recurrence consumes.
    xcol = jnp.stack([x[:, t:t + CK, :] for t in range(TM1)], axis=0)  # (TM1,B,CK,M)
    xcol = xcol.reshape(TM1, B, CKM)

    # pad batch 4 -> 8 (full sublane group), flatten time into rows, cast bf16
    pad = BP - B
    xcol = jnp.pad(xcol, ((0, 0), (0, pad), (0, 0)))
    xcol_flat = xcol.reshape(TM1 * BP, CKM).astype(jnp.bfloat16)
    h0p = jnp.pad(h0, ((0, pad), (0, 0)))
    c0p = jnp.pad(c0, ((0, pad), (0, 0)))

    # Single grid point; total working set < 100 KiB so no tiling / BlockSpecs
    # are needed.  (On v7x a "parallel" batch grid axis would only pay off with
    # many independent sequences.)
    res = pl.pallas_call(
        lstnet_attn_kernel,
        out_shape=jax.ShapeDtypeStruct((BP, M), jnp.float32),
    )(xcol_flat, convw_bf, conv_b, wih_bf, whh_bf, wcat_bf, b_lstm,
      att_w, att_b, linw_bf, lin_b, h0p, c0p)
    return res[:B]


# ---- deterministic parameter init (PyTorch-like shapes) ----------------------
def init_params(key):
    ks = jax.random.split(key, 10)

    def u(k, shape, bound):
        return jax.random.uniform(k, shape, jnp.float32, -bound, bound)

    conv_w = u(ks[0], (HIDC, CK, M), 1.0 / np.sqrt(CK * M))   # Conv2d(1,hidC,(Ck,M))
    conv_b = u(ks[1], (1, HIDC), 1.0 / np.sqrt(CK * M))
    w_ih = u(ks[2], (4 * HIDC, HIDC), 1.0 / np.sqrt(HIDC))    # LSTMCell(hidC, hidR)
    w_hh = u(ks[3], (4 * HIDC, HIDC), 1.0 / np.sqrt(HIDC))
    b_ih = u(ks[4], (4 * HIDC,), 1.0 / np.sqrt(HIDC))
    b_hh = u(ks[5], (4 * HIDC,), 1.0 / np.sqrt(HIDC))
    att_w = u(ks[6], (1, HIDC), 1.0 / np.sqrt(HIDC))          # Linear(hidC, 1)
    att_b = u(ks[7], (1, 1), 1.0 / np.sqrt(HIDC))
    lin_w = u(ks[8], (M, HIDC), 1.0 / np.sqrt(HIDC))          # Linear(hidR, m)
    lin_b = u(ks[9], (1, M), 1.0 / np.sqrt(HIDC))

    conv_w_flat = conv_w.transpose(1, 2, 0).reshape(CKM, HIDC)   # (Ck*M, hidC)
    wih_t = w_ih.T                                               # (H, 4H)
    whh_t = w_hh.T                                               # (H, 4H)
    wcat = jnp.concatenate([wih_t, whh_t], axis=0)               # (2H, 4H)
    lin_w_t = lin_w.T                                            # (H, M)

    # MXU operands stored in bf16 (the f32 reference uses the same rounded
    # values, so weight quantization cancels in the comparison).
    bf = lambda a: a.astype(jnp.bfloat16)
    return (bf(conv_w_flat), conv_b,
            bf(wih_t), bf(whh_t), bf(wcat),
            (b_ih + b_hh).reshape(1, 4 * HIDC),
            att_w, att_b,
            bf(lin_w_t), lin_b)


# ---- pure-JAX reference (matches PyTorch forward, eval dropout) --------------
def reference_forward(x, params, h0, c0):
    (convw_bf, conv_b, wih_bf, whh_bf, _wcat_bf, b_lstm,
     att_w, att_b, linw_bf, lin_b) = params
    convw = convw_bf.astype(jnp.float32)
    wih_t = wih_bf.astype(jnp.float32)
    whh_t = whh_bf.astype(jnp.float32)
    lin_w_t = linw_bf.astype(jnp.float32)

    xcol = jnp.stack([x[:, t:t + CK, :] for t in range(TM1)],
                     axis=0).reshape(TM1, B, CKM)
    conv = jax.nn.relu(jnp.einsum('tbf,fh->tbh', xcol, convw) + conv_b)

    def cell(xt, h, c):
        gates = xt @ wih_t + h @ whh_t + b_lstm
        i_g, f_g, g_g, o_g = jnp.split(gates, 4, axis=-1)
        i_g = jax.nn.sigmoid(i_g)
        f_g = jax.nn.sigmoid(f_g)
        g_g = jnp.tanh(g_g)
        o_g = jax.nn.sigmoid(o_g)
        c = f_g * c + i_g * g_g
        h = o_g * jnp.tanh(c)
        return h, c

    h, c = h0, c0
    outs = []
    for i in range(TM1):
        h, c = cell(conv[i], h, c)
        outs.append(h)
    O = jnp.stack(outs, axis=1)                       # (B, TM1, H)
    scores = O @ att_w.T + att_b[0]                   # (B, TM1, 1)
    sm = jax.nn.softmax(scores, axis=1)
    attn = (O * sm).sum(axis=1)
    combined = attn + O[:, -1, :]
    out_h, _ = cell(combined, h, c)
    return out_h @ lin_w_t + lin_b


if __name__ == "__main__":
    key = jax.random.PRNGKey(0)
    kx, kh, kc, kp = jax.random.split(key, 4)
    x = jax.random.normal(kx, (B, P, M), jnp.float32)
    # torch.randn initial states -> deterministic here
    h0 = jax.random.normal(kh, (B, HIDC), jnp.float32)
    c0 = jax.random.normal(kc, (B, HIDC), jnp.float32)
    params = init_params(kp)

    res = lstnet_attention_forward(x, params, h0, c0)
    res = jax.block_until_ready(res)

    ref = reference_forward(x, params, h0, c0)
    if not np.allclose(np.asarray(res), np.asarray(ref), atol=5e-2, rtol=5e-2):
        raise AssertionError("Pallas kernel result mismatch vs JAX reference")

    print("KERNEL_OK")
</pallas_src>

<mosaic_0001>
module attributes {stable_mosaic.version = 11 : i64} {
  func.func @lstnet_attn_kernel(%arg0: memref<80x48xbf16, #tpu.memory_space<vmem>>, %arg1: memref<48x32xbf16, #tpu.memory_space<vmem>>, %arg2: memref<1x32xf32, #tpu.memory_space<vmem>>, %arg3: memref<32x128xbf16, #tpu.memory_space<vmem>>, %arg4: memref<32x128xbf16, #tpu.memory_space<vmem>>, %arg5: memref<64x128xbf16, #tpu.memory_space<vmem>>, %arg6: memref<1x128xf32, #tpu.memory_space<vmem>>, %arg7: memref<1x32xf32, #tpu.memory_space<vmem>>, %arg8: memref<1x1xf32, #tpu.memory_space<vmem>>, %arg9: memref<32x8xbf16, #tpu.memory_space<vmem>>, %arg10: memref<1x8xf32, #tpu.memory_space<vmem>>, %arg11: memref<8x32xf32, #tpu.memory_space<vmem>>, %arg12: memref<8x32xf32, #tpu.memory_space<vmem>>, %arg13: memref<8x8xf32, #tpu.memory_space<vmem>>) attributes {dimension_semantics = [], scalar_prefetch = 0 : i64, scratch_operands = 0 : i64, tpu.core_type = #tpu.core_type<tc>} {
    %c0 = arith.constant 0 : index
    %c0_0 = arith.constant 0 : index
    %0 = vector.load %arg0[%c0, %c0_0] : memref<80x48xbf16, #tpu.memory_space<vmem>>, vector<80x48xbf16>
    %c0_1 = arith.constant 0 : index
    %c0_2 = arith.constant 0 : index
    %1 = vector.load %arg1[%c0_1, %c0_2] : memref<48x32xbf16, #tpu.memory_space<vmem>>, vector<48x32xbf16>
    %cst = arith.constant dense<0.000000e+00> : vector<80x32xf32>
    %2 = tpu.matmul %0, %1, %cst {dimension_numbers = #tpu.dot_dimension_numbers<[1], [0], [0], [1], [0, 0, 1, 1], [], []>} : vector<80x48xbf16>, vector<48x32xbf16>, vector<80x32xf32> -> vector<80x32xf32>
    %c0_3 = arith.constant 0 : index
    %c0_4 = arith.constant 0 : index
    %3 = vector.load %arg2[%c0_3, %c0_4] : memref<1x32xf32, #tpu.memory_space<vmem>>, vector<1x32xf32>
    %4 = vector.broadcast %3 : vector<1x32xf32> to vector<80x32xf32>
    %5 = arith.addf %2, %4 : vector<80x32xf32>
    %cst_5 = arith.constant 0.000000e+00 : f32
    %6 = vector.broadcast %cst_5 : f32 to vector<80x32xf32>
    %7 = arith.maximumf %5, %6 : vector<80x32xf32>
    %8 = arith.truncf %7 : vector<80x32xf32> to vector<80x32xbf16>
    %c0_6 = arith.constant 0 : index
    %c0_7 = arith.constant 0 : index
    %9 = vector.load %arg3[%c0_6, %c0_7] : memref<32x128xbf16, #tpu.memory_space<vmem>>, vector<32x128xbf16>
    %cst_8 = arith.constant dense<0.000000e+00> : vector<80x128xf32>
    %10 = tpu.matmul %8, %9, %cst_8 {dimension_numbers = #tpu.dot_dimension_numbers<[1], [0], [0], [1], [0, 0, 1, 1], [], []>} : vector<80x32xbf16>, vector<32x128xbf16>, vector<80x128xf32> -> vector<80x128xf32>
    %c0_9 = arith.constant 0 : index
    %c0_10 = arith.constant 0 : index
    %11 = vector.load %arg6[%c0_9, %c0_10] : memref<1x128xf32, #tpu.memory_space<vmem>>, vector<1x128xf32>
    %12 = vector.broadcast %11 : vector<1x128xf32> to vector<80x128xf32>
    %13 = arith.addf %10, %12 : vector<80x128xf32>
    %c0_11 = arith.constant 0 : index
    %c0_12 = arith.constant 0 : index
    %14 = vector.load %arg4[%c0_11, %c0_12] : memref<32x128xbf16, #tpu.memory_space<vmem>>, vector<32x128xbf16>
    %c0_13 = arith.constant 0 : index
    %c0_14 = arith.constant 0 : index
    %15 = vector.load %arg6[%c0_13, %c0_14] : memref<1x128xf32, #tpu.memory_space<vmem>>, vector<1x128xf32>
    %c0_15 = arith.constant 0 : index
    %c0_16 = arith.constant 0 : index
    %16 = vector.load %arg7[%c0_15, %c0_16] : memref<1x32xf32, #tpu.memory_space<vmem>>, vector<1x32xf32>
    %c0_17 = arith.constant 0 : index
    %c0_18 = arith.constant 0 : index
    %17 = vector.load %arg8[%c0_17, %c0_18] : memref<1x1xf32, #tpu.memory_space<vmem>>, vector<1x1xf32>
    %c0_19 = arith.constant 0 : index
    %c0_20 = arith.constant 0 : index
    %18 = vector.load %arg11[%c0_19, %c0_20] : memref<8x32xf32, #tpu.memory_space<vmem>>, vector<8x32xf32>
    %c0_21 = arith.constant 0 : index
    %c0_22 = arith.constant 0 : index
    %19 = vector.load %arg12[%c0_21, %c0_22] : memref<8x32xf32, #tpu.memory_space<vmem>>, vector<8x32xf32>
    %20 = vector.extract_strided_slice %13 {offsets = [0, 0], sizes = [8, 128], strides = [1, 1]} : vector<80x128xf32> to vector<8x128xf32>
    %21 = arith.truncf %18 : vector<8x32xf32> to vector<8x32xbf16>
    %cst_23 = arith.constant dense<0.000000e+00> : vector<8x128xf32>
    %22 = tpu.matmul %21, %14, %cst_23 {dimension_numbers = #tpu.dot_dimension_numbers<[1], [0], [0], [1], [0, 0, 1, 1], [], []>} : vector<8x32xbf16>, vector<32x128xbf16>, vector<8x128xf32> -> vector<8x128xf32>
    %23 = arith.addf %20, %22 : vector<8x128xf32>
    %24 = arith.negf %23 : vector<8x128xf32>
    %25 = math.exp %24 : vector<8x128xf32>
    %cst_24 = arith.constant 1.000000e+00 : f32
    %26 = vector.broadcast %cst_24 : f32 to vector<8x128xf32>
    %27 = arith.addf %26, %25 : vector<8x128xf32>
    %28 = arith.divf %26, %27 : vector<8x128xf32>
    %29 = math.tanh %23 : vector<8x128xf32>
    %30 = vector.extract_strided_slice %28 {offsets = [0, 0], sizes = [8, 32], strides = [1, 1]} : vector<8x128xf32> to vector<8x32xf32>
    %31 = vector.extract_strided_slice %28 {offsets = [0, 32], sizes = [8, 32], strides = [1, 1]} : vector<8x128xf32> to vector<8x32xf32>
    %32 = vector.extract_strided_slice %29 {offsets = [0, 64], sizes = [8, 32], strides = [1, 1]} : vector<8x128xf32> to vector<8x32xf32>
    %33 = vector.extract_strided_slice %28 {offsets = [0, 96], sizes = [8, 32], strides = [1, 1]} : vector<8x128xf32> to vector<8x32xf32>
    %34 = arith.mulf %31, %19 : vector<8x32xf32>
    %35 = arith.mulf %30, %32 : vector<8x32xf32>
    %36 = arith.addf %34, %35 : vector<8x32xf32>
    %37 = math.tanh %36 : vector<8x32xf32>
    %38 = arith.mulf %33, %37 : vector<8x32xf32>
    %39 = vector.broadcast %16 : vector<1x32xf32> to vector<8x32xf32>
    %40 = arith.mulf %38, %39 : vector<8x32xf32>
    %cst_25 = arith.constant dense<0.000000e+00> : vector<8xf32>
    %41 = vector.multi_reduction <add>, %40, %cst_25 [1] : vector<8x32xf32> to vector<8xf32>
    %42 = vector.shape_cast %41 : vector<8xf32> to vector<8x1xf32>
    %43 = vector.broadcast %17 : vector<1x1xf32> to vector<8x1xf32>
    %44 = arith.addf %42, %43 : vector<8x1xf32>
    %45 = vector.extract_strided_slice %13 {offsets = [8, 0], sizes = [8, 128], strides = [1, 1]} : vector<80x128xf32> to vector<8x128xf32>
    %46 = arith.truncf %38 : vector<8x32xf32> to vector<8x32xbf16>
    %cst_26 = arith.constant dense<0.000000e+00> : vector<8x128xf32>
    %47 = tpu.matmul %46, %14, %cst_26 {dimension_numbers = #tpu.dot_dimension_numbers<[1], [0], [0], [1], [0, 0, 1, 1], [], []>} : vector<8x32xbf16>, vector<32x128xbf16>, vector<8x128xf32> -> vector<8x128xf32>
    %48 = arith.addf %45, %47 : vector<8x128xf32>
    %49 = arith.negf %48 : vector<8x128xf32>
    %50 = math.exp %49 : vector<8x128xf32>
    %cst_27 = arith.constant 1.000000e+00 : f32
    %51 = vector.broadcast %cst_27 : f32 to vector<8x128xf32>
    %52 = arith.addf %51, %50 : vector<8x128xf32>
    %53 = arith.divf %51, %52 : vector<8x128xf32>
    %54 = math.tanh %48 : vector<8x128xf32>
    %55 = vector.extract_strided_slice %53 {offsets = [0, 0], sizes = [8, 32], strides = [1, 1]} : vector<8x128xf32> to vector<8x32xf32>
    %56 = vector.extract_strided_slice %53 {offsets = [0, 32], sizes = [8, 32], strides = [1, 1]} : vector<8x128xf32> to vector<8x32xf32>
    %57 = vector.extract_strided_slice %54 {offsets = [0, 64], sizes = [8, 32], strides = [1, 1]} : vector<8x128xf32> to vector<8x32xf32>
    %58 = vector.extract_strided_slice %53 {offsets = [0, 96], sizes = [8, 32], strides = [1, 1]} : vector<8x128xf32> to vector<8x32xf32>
    %59 = arith.mulf %56, %36 : vector<8x32xf32>
    %60 = arith.mulf %55, %57 : vector<8x32xf32>
    %61 = arith.addf %59, %60 : vector<8x32xf32>
    %62 = math.tanh %61 : vector<8x32xf32>
    %63 = arith.mulf %58, %62 : vector<8x32xf32>
    %64 = vector.broadcast %16 : vector<1x32xf32> to vector<8x32xf32>
    %65 = arith.mulf %63, %64 : vector<8x32xf32>
    %cst_28 = arith.constant dense<0.000000e+00> : vector<8xf32>
    %66 = vector.multi_reduction <add>, %65, %cst_28 [1] : vector<8x32xf32> to vector<8xf32>
    %67 = vector.shape_cast %66 : vector<8xf32> to vector<8x1xf32>
    %68 = vector.broadcast %17 : vector<1x1xf32> to vector<8x1xf32>
    %69 = arith.addf %67, %68 : vector<8x1xf32>
    %70 = vector.extract_strided_slice %13 {offsets = [16, 0], sizes = [8, 128], strides = [1, 1]} : vector<80x128xf32> to vector<8x128xf32>
    %71 = arith.truncf %63 : vector<8x32xf32> to vector<8x32xbf16>
    %cst_29 = arith.constant dense<0.000000e+00> : vector<8x128xf32>
    %72 = tpu.matmul %71, %14, %cst_29 {dimension_numbers = #tpu.dot_dimension_numbers<[1], [0], [0], [1], [0, 0, 1, 1], [], []>} : vector<8x32xbf16>, vector<32x128xbf16>, vector<8x128xf32> -> vector<8x128xf32>
    %73 = arith.addf %70, %72 : vector<8x128xf32>
    %74 = arith.negf %73 : vector<8x128xf32>
    %75 = math.exp %74 : vector<8x128xf32>
    %cst_30 = arith.constant 1.000000e+00 : f32
    %76 = vector.broadcast %cst_30 : f32 to vector<8x128xf32>
    %77 = arith.addf %76, %75 : vector<8x128xf32>
    %78 = arith.divf %76, %77 : vector<8x128xf32>
    %79 = math.tanh %73 : vector<8x128xf32>
    %80 = vector.extract_strided_slice %78 {offsets = [0, 0], sizes = [8, 32], strides = [1, 1]} : vector<8x128xf32> to vector<8x32xf32>
    %81 = vector.extract_strided_slice %78 {offsets = [0, 32], sizes = [8, 32], strides = [1, 1]} : vector<8x128xf32> to vector<8x32xf32>
    %82 = vector.extract_strided_slice %79 {offsets = [0, 64], sizes = [8, 32], strides = [1, 1]} : vector<8x128xf32> to vector<8x32xf32>
    %83 = vector.extract_strided_slice %78 {offsets = [0, 96], sizes = [8, 32], strides = [1, 1]} : vector<8x128xf32> to vector<8x32xf32>
    %84 = arith.mulf %81, %61 : vector<8x32xf32>
    %85 = arith.mulf %80, %82 : vector<8x32xf32>
    %86 = arith.addf %84, %85 : vector<8x32xf32>
    %87 = math.tanh %86 : vector<8x32xf32>
    %88 = arith.mulf %83, %87 : vector<8x32xf32>
    %89 = vector.broadcast %16 : vector<1x32xf32> to vector<8x32xf32>
    %90 = arith.mulf %88, %89 : vector<8x32xf32>
    %cst_31 = arith.constant dense<0.000000e+00> : vector<8xf32>
    %91 = vector.multi_reduction <add>, %90, %cst_31 [1] : vector<8x32xf32> to vector<8xf32>
    %92 = vector.shape_cast %91 : vector<8xf32> to vector<8x1xf32>
    %93 = vector.broadcast %17 : vector<1x1xf32> to vector<8x1xf32>
    %94 = arith.addf %92, %93 : vector<8x1xf32>
    %95 = vector.extract_strided_slice %13 {offsets = [24, 0], sizes = [8, 128], strides = [1, 1]} : vector<80x128xf32> to vector<8x128xf32>
    %96 = arith.truncf %88 : vector<8x32xf32> to vector<8x32xbf16>
    %cst_32 = arith.constant dense<0.000000e+00> : vector<8x128xf32>
    %97 = tpu.matmul %96, %14, %cst_32 {dimension_numbers = #tpu.dot_dimension_numbers<[1], [0], [0], [1], [0, 0, 1, 1], [], []>} : vector<8x32xbf16>, vector<32x128xbf16>, vector<8x128xf32> -> vector<8x128xf32>
    %98 = arith.addf %95, %97 : vector<8x128xf32>
    %99 = arith.negf %98 : vector<8x128xf32>
    %100 = math.exp %99 : vector<8x128xf32>
    %cst_33 = arith.constant 1.000000e+00 : f32
    %101 = vector.broadcast %cst_33 : f32 to vector<8x128xf32>
    %102 = arith.addf %101, %100 : vector<8x128xf32>
    %103 = arith.divf %101, %102 : vector<8x128xf32>
    %104 = math.tanh %98 : vector<8x128xf32>
    %105 = vector.extract_strided_slice %103 {offsets = [0, 0], sizes = [8, 32], strides = [1, 1]} : vector<8x128xf32> to vector<8x32xf32>
    %106 = vector.extract_strided_slice %103 {offsets = [0, 32], sizes = [8, 32], strides = [1, 1]} : vector<8x128xf32> to vector<8x32xf32>
    %107 = vector.extract_strided_slice %104 {offsets = [0, 64], sizes = [8, 32], strides = [1, 1]} : vector<8x128xf32> to vector<8x32xf32>
    %108 = vector.extract_strided_slice %103 {offsets = [0, 96], sizes = [8, 32], strides = [1, 1]} : vector<8x128xf32> to vector<8x32xf32>
    %109 = arith.mulf %106, %86 : vector<8x32xf32>
    %110 = arith.mulf %105, %107 : vector<8x32xf32>
    %111 = arith.addf %109, %110 : vector<8x32xf32>
    %112 = math.tanh %111 : vector<8x32xf32>
    %113 = arith.mulf %108, %112 : vector<8x32xf32>
    %114 = vector.broadcast %16 : vector<1x32xf32> to vector<8x32xf32>
    %115 = arith.mulf %113, %114 : vector<8x32xf32>
    %cst_34 = arith.constant dense<0.000000e+00> : vector<8xf32>
    %116 = vector.multi_reduction <add>, %115, %cst_34 [1] : vector<8x32xf32> to vector<8xf32>
    %117 = vector.shape_cast %116 : vector<8xf32> to vector<8x1xf32>
    %118 = vector.broadcast %17 : vector<1x1xf32> to vector<8x1xf32>
    %119 = arith.addf %117, %118 : vector<8x1xf32>
    %120 = vector.extract_strided_slice %13 {offsets = [32, 0], sizes = [8, 128], strides = [1, 1]} : vector<80x128xf32> to vector<8x128xf32>
    %121 = arith.truncf %113 : vector<8x32xf32> to vector<8x32xbf16>
    %cst_35 = arith.constant dense<0.000000e+00> : vector<8x128xf32>
    %122 = tpu.matmul %121, %14, %cst_35 {dimension_numbers = #tpu.dot_dimension_numbers<[1], [0], [0], [1], [0, 0, 1, 1], [], []>} : vector<8x32xbf16>, vector<32x128xbf16>, vector<8x128xf32> -> vector<8x128xf32>
    %123 = arith.addf %120, %122 : vector<8x128xf32>
    %124 = arith.negf %123 : vector<8x128xf32>
    %125 = math.exp %124 : vector<8x128xf32>
    %cst_36 = arith.constant 1.000000e+00 : f32
    %126 = vector.broadcast %cst_36 : f32 to vector<8x128xf32>
    %127 = arith.addf %126, %125 : vector<8x128xf32>
    %128 = arith.divf %126, %127 : vector<8x128xf32>
    %129 = math.tanh %123 : vector<8x128xf32>
    %130 = vector.extract_strided_slice %128 {offsets = [0, 0], sizes = [8, 32], strides = [1, 1]} : vector<8x128xf32> to vector<8x32xf32>
    %131 = vector.extract_strided_slice %128 {offsets = [0, 32], sizes = [8, 32], strides = [1, 1]} : vector<8x128xf32> to vector<8x32xf32>
    %132 = vector.extract_strided_slice %129 {offsets = [0, 64], sizes = [8, 32], strides = [1, 1]} : vector<8x128xf32> to vector<8x32xf32>
    %133 = vector.extract_strided_slice %128 {offsets = [0, 96], sizes = [8, 32], strides = [1, 1]} : vector<8x128xf32> to vector<8x32xf32>
    %134 = arith.mulf %131, %111 : vector<8x32xf32>
    %135 = arith.mulf %130, %132 : vector<8x32xf32>
    %136 = arith.addf %134, %135 : vector<8x32xf32>
    %137 = math.tanh %136 : vector<8x32xf32>
    %138 = arith.mulf %133, %137 : vector<8x32xf32>
    %139 = vector.broadcast %16 : vector<1x32xf32> to vector<8x32xf32>
    %140 = arith.mulf %138, %139 : vector<8x32xf32>
    %cst_37 = arith.constant dense<0.000000e+00> : vector<8xf32>
    %141 = vector.multi_reduction <add>, %140, %cst_37 [1] : vector<8x32xf32> to vector<8xf32>
    %142 = vector.shape_cast %141 : vector<8xf32> to vector<8x1xf32>
    %143 = vector.broadcast %17 : vector<1x1xf32> to vector<8x1xf32>
    %144 = arith.addf %142, %143 : vector<8x1xf32>
    %145 = vector.extract_strided_slice %13 {offsets = [40, 0], sizes = [8, 128], strides = [1, 1]} : vector<80x128xf32> to vector<8x128xf32>
    %146 = arith.truncf %138 : vector<8x32xf32> to vector<8x32xbf16>
    %cst_38 = arith.constant dense<0.000000e+00> : vector<8x128xf32>
    %147 = tpu.matmul %146, %14, %cst_38 {dimension_numbers = #tpu.dot_dimension_numbers<[1], [0], [0], [1], [0, 0, 1, 1], [], []>} : vector<8x32xbf16>, vector<32x128xbf16>, vector<8x128xf32> -> vector<8x128xf32>
    %148 = arith.addf %145, %147 : vector<8x128xf32>
    %149 = arith.negf %148 : vector<8x128xf32>
    %150 = math.exp %149 : vector<8x128xf32>
    %cst_39 = arith.constant 1.000000e+00 : f32
    %151 = vector.broadcast %cst_39 : f32 to vector<8x128xf32>
    %152 = arith.addf %151, %150 : vector<8x128xf32>
    %153 = arith.divf %151, %152 : vector<8x128xf32>
    %154 = math.tanh %148 : vector<8x128xf32>
    %155 = vector.extract_strided_slice %153 {offsets = [0, 0], sizes = [8, 32], strides = [1, 1]} : vector<8x128xf32> to vector<8x32xf32>
    %156 = vector.extract_strided_slice %153 {offsets = [0, 32], sizes = [8, 32], strides = [1, 1]} : vector<8x128xf32> to vector<8x32xf32>
    %157 = vector.extract_strided_slice %154 {offsets = [0, 64], sizes = [8, 32], strides = [1, 1]} : vector<8x128xf32> to vector<8x32xf32>
    %158 = vector.extract_strided_slice %153 {offsets = [0, 96], sizes = [8, 32], strides = [1, 1]} : vector<8x128xf32> to vector<8x32xf32>
    %159 = arith.mulf %156, %136 : vector<8x32xf32>
    %160 = arith.mulf %155, %157 : vector<8x32xf32>
    %161 = arith.addf %159, %160 : vector<8x32xf32>
    %162 = math.tanh %161 : vector<8x32xf32>
    %163 = arith.mulf %158, %162 : vector<8x32xf32>
    %164 = vector.broadcast %16 : vector<1x32xf32> to vector<8x32xf32>
    %165 = arith.mulf %163, %164 : vector<8x32xf32>
    %cst_40 = arith.constant dense<0.000000e+00> : vector<8xf32>
    %166 = vector.multi_reduction <add>, %165, %cst_40 [1] : vector<8x32xf32> to vector<8xf32>
    %167 = vector.shape_cast %166 : vector<8xf32> to vector<8x1xf32>
    %168 = vector.broadcast %17 : vector<1x1xf32> to vector<8x1xf32>
    %169 = arith.addf %167, %168 : vector<8x1xf32>
    %170 = vector.extract_strided_slice %13 {offsets = [48, 0], sizes = [8, 128], strides = [1, 1]} : vector<80x128xf32> to vector<8x128xf32>
    %171 = arith.truncf %163 : vector<8x32xf32> to vector<8x32xbf16>
    %cst_41 = arith.constant dense<0.000000e+00> : vector<8x128xf32>
    %172 = tpu.matmul %171, %14, %cst_41 {dimension_numbers = #tpu.dot_dimension_numbers<[1], [0], [0], [1], [0, 0, 1, 1], [], []>} : vector<8x32xbf16>, vector<32x128xbf16>, vector<8x128xf32> -> vector<8x128xf32>
    %173 = arith.addf %170, %172 : vector<8x128xf32>
    %174 = arith.negf %173 : vector<8x128xf32>
    %175 = math.exp %174 : vector<8x128xf32>
    %cst_42 = arith.constant 1.000000e+00 : f32
    %176 = vector.broadcast %cst_42 : f32 to vector<8x128xf32>
    %177 = arith.addf %176, %175 : vector<8x128xf32>
    %178 = arith.divf %176, %177 : vector<8x128xf32>
    %179 = math.tanh %173 : vector<8x128xf32>
    %180 = vector.extract_strided_slice %178 {offsets = [0, 0], sizes = [8, 32], strides = [1, 1]} : vector<8x128xf32> to vector<8x32xf32>
    %181 = vector.extract_strided_slice %178 {offsets = [0, 32], sizes = [8, 32], strides = [1, 1]} : vector<8x128xf32> to vector<8x32xf32>
    %182 = vector.extract_strided_slice %179 {offsets = [0, 64], sizes = [8, 32], strides = [1, 1]} : vector<8x128xf32> to vector<8x32xf32>
    %183 = vector.extract_strided_slice %178 {offsets = [0, 96], sizes = [8, 32], strides = [1, 1]} : vector<8x128xf32> to vector<8x32xf32>
    %184 = arith.mulf %181, %161 : vector<8x32xf32>
    %185 = arith.mulf %180, %182 : vector<8x32xf32>
    %186 = arith.addf %184, %185 : vector<8x32xf32>
    %187 = math.tanh %186 : vector<8x32xf32>
    %188 = arith.mulf %183, %187 : vector<8x32xf32>
    %189 = vector.broadcast %16 : vector<1x32xf32> to vector<8x32xf32>
    %190 = arith.mulf %188, %189 : vector<8x32xf32>
    %cst_43 = arith.constant dense<0.000000e+00> : vector<8xf32>
    %191 = vector.multi_reduction <add>, %190, %cst_43 [1] : vector<8x32xf32> to vector<8xf32>
    %192 = vector.shape_cast %191 : vector<8xf32> to vector<8x1xf32>
    %193 = vector.broadcast %17 : vector<1x1xf32> to vector<8x1xf32>
    %194 = arith.addf %192, %193 : vector<8x1xf32>
    %195 = vector.extract_strided_slice %13 {offsets = [56, 0], sizes = [8, 128], strides = [1, 1]} : vector<80x128xf32> to vector<8x128xf32>
    %196 = arith.truncf %188 : vector<8x32xf32> to vector<8x32xbf16>
    %cst_44 = arith.constant dense<0.000000e+00> : vector<8x128xf32>
    %197 = tpu.matmul %196, %14, %cst_44 {dimension_numbers = #tpu.dot_dimension_numbers<[1], [0], [0], [1], [0, 0, 1, 1], [], []>} : vector<8x32xbf16>, vector<32x128xbf16>, vector<8x128xf32> -> vector<8x128xf32>
    %198 = arith.addf %195, %197 : vector<8x128xf32>
    %199 = arith.negf %198 : vector<8x128xf32>
    %200 = math.exp %199 : vector<8x128xf32>
    %cst_45 = arith.constant 1.000000e+00 : f32
    %201 = vector.broadcast %cst_45 : f32 to vector<8x128xf32>
    %202 = arith.addf %201, %200 : vector<8x128xf32>
    %203 = arith.divf %201, %202 : vector<8x128xf32>
    %204 = math.tanh %198 : vector<8x128xf32>
    %205 = vector.extract_strided_slice %203 {offsets = [0, 0], sizes = [8, 32], strides = [1, 1]} : vector<8x128xf32> to vector<8x32xf32>
    %206 = vector.extract_strided_slice %203 {offsets = [0, 32], sizes = [8, 32], strides = [1, 1]} : vector<8x128xf32> to vector<8x32xf32>
    %207 = vector.extract_strided_slice %204 {offsets = [0, 64], sizes = [8, 32], strides = [1, 1]} : vector<8x128xf32> to vector<8x32xf32>
    %208 = vector.extract_strided_slice %203 {offsets = [0, 96], sizes = [8, 32], strides = [1, 1]} : vector<8x128xf32> to vector<8x32xf32>
    %209 = arith.mulf %206, %186 : vector<8x32xf32>
    %210 = arith.mulf %205, %207 : vector<8x32xf32>
    %211 = arith.addf %209, %210 : vector<8x32xf32>
    %212 = math.tanh %211 : vector<8x32xf32>
    %213 = arith.mulf %208, %212 : vector<8x32xf32>
    %214 = vector.broadcast %16 : vector<1x32xf32> to vector<8x32xf32>
    %215 = arith.mulf %213, %214 : vector<8x32xf32>
    %cst_46 = arith.constant dense<0.000000e+00> : vector<8xf32>
    %216 = vector.multi_reduction <add>, %215, %cst_46 [1] : vector<8x32xf32> to vector<8xf32>
    %217 = vector.shape_cast %216 : vector<8xf32> to vector<8x1xf32>
    %218 = vector.broadcast %17 : vector<1x1xf32> to vector<8x1xf32>
    %219 = arith.addf %217, %218 : vector<8x1xf32>
    %220 = vector.extract_strided_slice %13 {offsets = [64, 0], sizes = [8, 128], strides = [1, 1]} : vector<80x128xf32> to vector<8x128xf32>
    %221 = arith.truncf %213 : vector<8x32xf32> to vector<8x32xbf16>
    %cst_47 = arith.constant dense<0.000000e+00> : vector<8x128xf32>
    %222 = tpu.matmul %221, %14, %cst_47 {dimension_numbers = #tpu.dot_dimension_numbers<[1], [0], [0], [1], [0, 0, 1, 1], [], []>} : vector<8x32xbf16>, vector<32x128xbf16>, vector<8x128xf32> -> vector<8x128xf32>
    %223 = arith.addf %220, %222 : vector<8x128xf32>
    %224 = arith.negf %223 : vector<8x128xf32>
    %225 = math.exp %224 : vector<8x128xf32>
    %cst_48 = arith.constant 1.000000e+00 : f32
    %226 = vector.broadcast %cst_48 : f32 to vector<8x128xf32>
    %227 = arith.addf %226, %225 : vector<8x128xf32>
    %228 = arith.divf %226, %227 : vector<8x128xf32>
    %229 = math.tanh %223 : vector<8x128xf32>
    %230 = vector.extract_strided_slice %228 {offsets = [0, 0], sizes = [8, 32], strides = [1, 1]} : vector<8x128xf32> to vector<8x32xf32>
    %231 = vector.extract_strided_slice %228 {offsets = [0, 32], sizes = [8, 32], strides = [1, 1]} : vector<8x128xf32> to vector<8x32xf32>
    %232 = vector.extract_strided_slice %229 {offsets = [0, 64], sizes = [8, 32], strides = [1, 1]} : vector<8x128xf32> to vector<8x32xf32>
    %233 = vector.extract_strided_slice %228 {offsets = [0, 96], sizes = [8, 32], strides = [1, 1]} : vector<8x128xf32> to vector<8x32xf32>
    %234 = arith.mulf %231, %211 : vector<8x32xf32>
    %235 = arith.mulf %230, %232 : vector<8x32xf32>
    %236 = arith.addf %234, %235 : vector<8x32xf32>
    %237 = math.tanh %236 : vector<8x32xf32>
    %238 = arith.mulf %233, %237 : vector<8x32xf32>
    %239 = vector.broadcast %16 : vector<1x32xf32> to vector<8x32xf32>
    %240 = arith.mulf %238, %239 : vector<8x32xf32>
    %cst_49 = arith.constant dense<0.000000e+00> : vector<8xf32>
    %241 = vector.multi_reduction <add>, %240, %cst_49 [1] : vector<8x32xf32> to vector<8xf32>
    %242 = vector.shape_cast %241 : vector<8xf32> to vector<8x1xf32>
    %243 = vector.broadcast %17 : vector<1x1xf32> to vector<8x1xf32>
    %244 = arith.addf %242, %243 : vector<8x1xf32>
    %245 = vector.extract_strided_slice %13 {offsets = [72, 0], sizes = [8, 128], strides = [1, 1]} : vector<80x128xf32> to vector<8x128xf32>
    %246 = arith.truncf %238 : vector<8x32xf32> to vector<8x32xbf16>
    %cst_50 = arith.constant dense<0.000000e+00> : vector<8x128xf32>
    %247 = tpu.matmul %246, %14, %cst_50 {dimension_numbers = #tpu.dot_dimension_numbers<[1], [0], [0], [1], [0, 0, 1, 1], [], []>} : vector<8x32xbf16>, vector<32x128xbf16>, vector<8x128xf32> -> vector<8x128xf32>
    %248 = arith.addf %245, %247 : vector<8x128xf32>
    %249 = arith.negf %248 : vector<8x128xf32>
    %250 = math.exp %249 : vector<8x128xf32>
    %cst_51 = arith.constant 1.000000e+00 : f32
    %251 = vector.broadcast %cst_51 : f32 to vector<8x128xf32>
    %252 = arith.addf %251, %250 : vector<8x128xf32>
    %253 = arith.divf %251, %252 : vector<8x128xf32>
    %254 = math.tanh %248 : vector<8x128xf32>
    %255 = vector.extract_strided_slice %253 {offsets = [0, 0], sizes = [8, 32], strides = [1, 1]} : vector<8x128xf32> to vector<8x32xf32>
    %256 = vector.extract_strided_slice %253 {offsets = [0, 32], sizes = [8, 32], strides = [1, 1]} : vector<8x128xf32> to vector<8x32xf32>
    %257 = vector.extract_strided_slice %254 {offsets = [0, 64], sizes = [8, 32], strides = [1, 1]} : vector<8x128xf32> to vector<8x32xf32>
    %258 = vector.extract_strided_slice %253 {offsets = [0, 96], sizes = [8, 32], strides = [1, 1]} : vector<8x128xf32> to vector<8x32xf32>
    %259 = arith.mulf %256, %236 : vector<8x32xf32>
    %260 = arith.mulf %255, %257 : vector<8x32xf32>
    %261 = arith.addf %259, %260 : vector<8x32xf32>
    %262 = math.tanh %261 : vector<8x32xf32>
    %263 = arith.mulf %258, %262 : vector<8x32xf32>
    %264 = vector.broadcast %16 : vector<1x32xf32> to vector<8x32xf32>
    %265 = arith.mulf %263, %264 : vector<8x32xf32>
    %cst_52 = arith.constant dense<0.000000e+00> : vector<8xf32>
    %266 = vector.multi_reduction <add>, %265, %cst_52 [1] : vector<8x32xf32> to vector<8xf32>
    %267 = vector.shape_cast %266 : vector<8xf32> to vector<8x1xf32>
    %268 = vector.broadcast %17 : vector<1x1xf32> to vector<8x1xf32>
    %269 = arith.addf %267, %268 : vector<8x1xf32>
    %270 = arith.maximumf %44, %69 : vector<8x1xf32>
    %271 = arith.maximumf %270, %94 : vector<8x1xf32>
    %272 = arith.maximumf %271, %119 : vector<8x1xf32>
    %273 = arith.maximumf %272, %144 : vector<8x1xf32>
    %274 = arith.maximumf %273, %169 : vector<8x1xf32>
    %275 = arith.maximumf %274, %194 : vector<8x1xf32>
    %276 = arith.maximumf %275, %219 : vector<8x1xf32>
    %277 = arith.maximumf %276, %244 : vector<8x1xf32>
    %278 = arith.maximumf %277, %269 : vector<8x1xf32>
    %279 = arith.subf %44, %278 : vector<8x1xf32>
    %280 = math.exp %279 : vector<8x1xf32>
    %281 = arith.subf %69, %278 : vector<8x1xf32>
    %282 = math.exp %281 : vector<8x1xf32>
    %283 = arith.subf %94, %278 : vector<8x1xf32>
    %284 = math.exp %283 : vector<8x1xf32>
    %285 = arith.subf %119, %278 : vector<8x1xf32>
    %286 = math.exp %285 : vector<8x1xf32>
    %287 = arith.subf %144, %278 : vector<8x1xf32>
    %288 = math.exp %287 : vector<8x1xf32>
    %289 = arith.subf %169, %278 : vector<8x1xf32>
    %290 = math.exp %289 : vector<8x1xf32>
    %291 = arith.subf %194, %278 : vector<8x1xf32>
    %292 = math.exp %291 : vector<8x1xf32>
    %293 = arith.subf %219, %278 : vector<8x1xf32>
    %294 = math.exp %293 : vector<8x1xf32>
    %295 = arith.subf %244, %278 : vector<8x1xf32>
    %296 = math.exp %295 : vector<8x1xf32>
    %297 = arith.subf %269, %278 : vector<8x1xf32>
    %298 = math.exp %297 : vector<8x1xf32>
    %299 = arith.addf %280, %282 : vector<8x1xf32>
    %300 = arith.addf %299, %284 : vector<8x1xf32>
    %301 = arith.addf %300, %286 : vector<8x1xf32>
    %302 = arith.addf %301, %288 : vector<8x1xf32>
    %303 = arith.addf %302, %290 : vector<8x1xf32>
    %304 = arith.addf %303, %292 : vector<8x1xf32>
    %305 = arith.addf %304, %294 : vector<8x1xf32>
    %306 = arith.addf %305, %296 : vector<8x1xf32>
    %307 = arith.addf %306, %298 : vector<8x1xf32>
    %cst_53 = arith.constant 1.000000e+00 : f32
    %308 = vector.broadcast %cst_53 : f32 to vector<8x1xf32>
    %309 = arith.divf %308, %307 : vector<8x1xf32>
    %cst_54 = arith.constant 0.000000e+00 : f32
    %310 = vector.broadcast %cst_54 : f32 to vector<8x32xf32>
    %311 = arith.mulf %280, %309 : vector<8x1xf32>
    %312 = vector.broadcast %311 : vector<8x1xf32> to vector<8x32xf32>
    %313 = arith.mulf %38, %312 : vector<8x32xf32>
    %314 = arith.addf %310, %313 : vector<8x32xf32>
    %315 = arith.mulf %282, %309 : vector<8x1xf32>
    %316 = vector.broadcast %315 : vector<8x1xf32> to vector<8x32xf32>
    %317 = arith.mulf %63, %316 : vector<8x32xf32>
    %318 = arith.addf %314, %317 : vector<8x32xf32>
    %319 = arith.mulf %284, %309 : vector<8x1xf32>
    %320 = vector.broadcast %319 : vector<8x1xf32> to vector<8x32xf32>
    %321 = arith.mulf %88, %320 : vector<8x32xf32>
    %322 = arith.addf %318, %321 : vector<8x32xf32>
    %323 = arith.mulf %286, %309 : vector<8x1xf32>
    %324 = vector.broadcast %323 : vector<8x1xf32> to vector<8x32xf32>
    %325 = arith.mulf %113, %324 : vector<8x32xf32>
    %326 = arith.addf %322, %325 : vector<8x32xf32>
    %327 = arith.mulf %288, %309 : vector<8x1xf32>
    %328 = vector.broadcast %327 : vector<8x1xf32> to vector<8x32xf32>
    %329 = arith.mulf %138, %328 : vector<8x32xf32>
    %330 = arith.addf %326, %329 : vector<8x32xf32>
    %331 = arith.mulf %290, %309 : vector<8x1xf32>
    %332 = vector.broadcast %331 : vector<8x1xf32> to vector<8x32xf32>
    %333 = arith.mulf %163, %332 : vector<8x32xf32>
    %334 = arith.addf %330, %333 : vector<8x32xf32>
    %335 = arith.mulf %292, %309 : vector<8x1xf32>
    %336 = vector.broadcast %335 : vector<8x1xf32> to vector<8x32xf32>
    %337 = arith.mulf %188, %336 : vector<8x32xf32>
    %338 = arith.addf %334, %337 : vector<8x32xf32>
    %339 = arith.mulf %294, %309 : vector<8x1xf32>
    %340 = vector.broadcast %339 : vector<8x1xf32> to vector<8x32xf32>
    %341 = arith.mulf %213, %340 : vector<8x32xf32>
    %342 = arith.addf %338, %341 : vector<8x32xf32>
    %343 = arith.mulf %296, %309 : vector<8x1xf32>
    %344 = vector.broadcast %343 : vector<8x1xf32> to vector<8x32xf32>
    %345 = arith.mulf %238, %344 : vector<8x32xf32>
    %346 = arith.addf %342, %345 : vector<8x32xf32>
    %347 = arith.mulf %298, %309 : vector<8x1xf32>
    %348 = vector.broadcast %347 : vector<8x1xf32> to vector<8x32xf32>
    %349 = arith.mulf %263, %348 : vector<8x32xf32>
    %350 = arith.addf %346, %349 : vector<8x32xf32>
    %351 = arith.addf %350, %263 : vector<8x32xf32>
    %352 = tpu.concatenate %351, %263 in 1 : vector<8x32xf32>, vector<8x32xf32> -> vector<8x64xf32>
    %353 = arith.truncf %352 : vector<8x64xf32> to vector<8x64xbf16>
    %c0_55 = arith.constant 0 : index
    %c0_56 = arith.constant 0 : index
    %354 = vector.load %arg5[%c0_55, %c0_56] : memref<64x128xbf16, #tpu.memory_space<vmem>>, vector<64x128xbf16>
    %cst_57 = arith.constant dense<0.000000e+00> : vector<8x128xf32>
    %355 = tpu.matmul %353, %354, %cst_57 {dimension_numbers = #tpu.dot_dimension_numbers<[1], [0], [0], [1], [0, 0, 1, 1], [], []>} : vector<8x64xbf16>, vector<64x128xbf16>, vector<8x128xf32> -> vector<8x128xf32>
    %356 = vector.broadcast %15 : vector<1x128xf32> to vector<8x128xf32>
    %357 = arith.addf %355, %356 : vector<8x128xf32>
    %358 = arith.negf %357 : vector<8x128xf32>
    %359 = math.exp %358 : vector<8x128xf32>
    %cst_58 = arith.constant 1.000000e+00 : f32
    %360 = vector.broadcast %cst_58 : f32 to vector<8x128xf32>
    %361 = arith.addf %360, %359 : vector<8x128xf32>
    %362 = arith.divf %360, %361 : vector<8x128xf32>
    %363 = math.tanh %357 : vector<8x128xf32>
    %364 = vector.extract_strided_slice %362 {offsets = [0, 0], sizes = [8, 32], strides = [1, 1]} : vector<8x128xf32> to vector<8x32xf32>
    %365 = vector.extract_strided_slice %362 {offsets = [0, 32], sizes = [8, 32], strides = [1, 1]} : vector<8x128xf32> to vector<8x32xf32>
    %366 = vector.extract_strided_slice %363 {offsets = [0, 64], sizes = [8, 32], strides = [1, 1]} : vector<8x128xf32> to vector<8x32xf32>
    %367 = vector.extract_strided_slice %362 {offsets = [0, 96], sizes = [8, 32], strides = [1, 1]} : vector<8x128xf32> to vector<8x32xf32>
    %368 = arith.mulf %365, %261 : vector<8x32xf32>
    %369 = arith.mulf %364, %366 : vector<8x32xf32>
    %370 = arith.addf %368, %369 : vector<8x32xf32>
    %371 = math.tanh %370 : vector<8x32xf32>
    %372 = arith.mulf %367, %371 : vector<8x32xf32>
    %373 = arith.truncf %372 : vector<8x32xf32> to vector<8x32xbf16>
    %c0_59 = arith.constant 0 : index
    %c0_60 = arith.constant 0 : index
    %374 = vector.load %arg9[%c0_59, %c0_60] : memref<32x8xbf16, #tpu.memory_space<vmem>>, vector<32x8xbf16>
    %cst_61 = arith.constant dense<0.000000e+00> : vector<8x8xf32>
    %375 = tpu.matmul %373, %374, %cst_61 {dimension_numbers = #tpu.dot_dimension_numbers<[1], [0], [0], [1], [0, 0, 1, 1], [], []>} : vector<8x32xbf16>, vector<32x8xbf16>, vector<8x8xf32> -> vector<8x8xf32>
    %c0_62 = arith.constant 0 : index
    %c0_63 = arith.constant 0 : index
    %376 = vector.load %arg10[%c0_62, %c0_63] : memref<1x8xf32, #tpu.memory_space<vmem>>, vector<1x8xf32>
    %377 = vector.broadcast %376 : vector<1x8xf32> to vector<8x8xf32>
    %378 = arith.addf %375, %377 : vector<8x8xf32>
    %c0_64 = arith.constant 0 : index
    %c0_65 = arith.constant 0 : index
    %379 = vector.load %arg13[%c0_64, %c0_65] : memref<8x8xf32, #tpu.memory_space<vmem>>, vector<8x8xf32>
    tpu.vector_store %arg13[%c0_64, %c0_65], %378 {strides = array<i32>} : memref<8x8xf32, #tpu.memory_space<vmem>>, vector<8x8xf32>,
    return
  }
}

</mosaic_0001>

<bundles_post_ra>
// kernel: tpu_custom_call.1
= control target key start
LH: loop header
LB: loop body
LE: loop exit
PB: predicated region body
PF: predicated region fallthrough
CT: control target
= control target key end

     0   :  { %s2377_s0 = inlined_call_operand.vmem [shape: bf16[80,48], index: 0, kind: input, shape index: {}]   ;;  %s2378_s1 = inlined_call_operand.vmem [shape: bf16[48,32], index: 1, kind: input, shape index: {}]   ;;  %s2379_s2 = inlined_call_operand.vmem [shape: f32[1,32], index: 2, kind: input, shape index: {}]   ;;  %s2380_s3 = inlined_call_operand.vmem [shape: bf16[32,128], index: 3, kind: input, shape index: {}]   ;;  %s2381_s4 = inlined_call_operand.vmem [shape: bf16[32,128], index: 4, kind: input, shape index: {}]   ;;  %s2382_s5 = inlined_call_operand.vmem [shape: bf16[64,128], index: 5, kind: input, shape index: {}]   ;;  %s2383_s6 = inlined_call_operand.vmem [shape: f32[1,128], index: 6, kind: input, shape index: {}]   ;;  %s2384_s7 = inlined_call_operand.vmem [shape: f32[1,32], index: 7, kind: input, shape index: {}]   ;;  %s2385_s8 = inlined_call_operand.<no memory space> [shape: f32[1,1], index: 8, kind: input, shape index: {}]   ;;  %s2386_s9 = inlined_call_operand.vmem [shape: bf16[32,8], index: 9, kind: input, shape index: {}]   ;;  %s2387_s10 = inlined_call_operand.vmem [shape: f32[1,8], index: 10, kind: input, shape index: {}]   ;;  %s2388_s11 = inlined_call_operand.vmem [shape: f32[8,32], index: 11, kind: input, shape index: {}]   ;;  %s2389_s12 = inlined_call_operand.vmem [shape: f32[8,32], index: 12, kind: input, shape index: {}]   ;;  %s2390_s13 = inlined_call_operand.hbm [shape: f32[8,8], index: 13, kind: output, shape index: {}]  }
   0x1   :  { %v18_v0 = vstv %s2385_s8 }
   0x2   :  { %19 = vst [vmem:[#allocation2] sm:$0x1] %v18_v0 }
   0x3   :  { %v1770_v1 = vld [vmem:[%s2378_s1] sm:$0xff]   ;;  %v1923_v2 = vmov 0.0   ;;  %v1771_v3 = vld [vmem:[%s2378_s1 + $0x8] sm:$0xff]   ;;  %vm1924_vm0 = vmmov 0   ;;  %v1772_v4 = vld [vmem:[%s2378_s1 + $0x10] sm:$0xff]   ;;  %vm114_vm1 = vcmask 392192  }
   0x4   :  { %1611 = vmatprep.subr.bf16.mxu0 %v1923_v2  ;;  %1637 = vmatprep.subr.bf16.mxu1 %v1923_v2  ;;  %v1773_v5 = vld [vmem:[%s2377_s0] sm:$0xff]  }
   0x5   :  { %1612 = vmatpush3.bf16.msra.mxu0 %v1770_v1  ;;  %1617 = vmatprep.mubr.msk.bf16.mxu0 %vm1924_vm0, %v1923_v2 }
   0x6   :  { %1613 = vmatprep.subr.bf16.mxu0 %v1923_v2  ;;  %1641 = vmatprep.mubr.msk.bf16.mxu1 %vm1924_vm0, %v1923_v2 }
   0x9   :  { %1614 = vmatpush3.bf16.msra.mxu0 %v1771_v3 }
   0xa   :  { %1615 = vmatprep.subr.bf16.mxu0 %v1923_v2 }
   0xd   :  { %1616 = vmatpush3.bf16.msra.mxu0 %v1772_v4 }
   0xe   :  { %1669 = vmatprep.subr.bf16.mxu0 %v1923_v2 }
  0x10   :  { %1618 = vmatmul.mubr.msk.bf16.vlgmr.msra.gmra.mrb[0].mxu0 %vm114_vm1, %v1773_v5 }
  0x11   :  { %1621 = vmatprep.mubr.msk.bf16.mxu0 %vm1924_vm0, %v1923_v2 }
  0x12   :  { %20 = vsyncpa [#allocation4], 0  ;;  %v1774_v6 = vld [vmem:[%s2377_s0 + $0x8] sm:$0xff]   ;;  %v1775_v7 = vld [vmem:[%s2377_s0 + $0x10] sm:$0xff]   ;;  %vm241_vm2 = vcmask 261120   ;;  %s1925_s15 = smov 64  }
  0x13   :  { %v1776_v8 = vld [vmem:[%s2377_s0 + $0x18] sm:$0xff]   ;;  %v1777_v9 = vld [vmem:[%s2377_s0 + $0x20] sm:$0xff]   ;;  %v1779_v11 = vld [vmem:[%s2380_s3 + $0x8] sm:$0xff]   ;;  %s1926_s18 = smov 32   ;;  %s1927_s19 = smov 96   ;;  %vm1348_vm3 = vcmask 523264  }
  0x14   :  { %v1778_v10 = vld [vmem:[%s2380_s3] sm:$0xff]   ;;  %v2069_v13 = vld [vmem:[%s2381_s4 + $0x8] sm:$0xff]   ;;  %s1929_s8 = smov [#allocation3]   ;;  %vm1486_vm4 = vcmask 64512  }
  0x15   :  { %1638 = vmatpush3.bf16.msra.mxu1 %v1778_v10  ;;  %v2062_v12 = vld [vmem:[%s2381_s4] sm:$0xff]  }
  0x16   :  { %1639 = vmatprep.subr.bf16.mxu1 %v1923_v2  ;;  %1670 = vmatpush3.bf16.msra.mxu0 %v2062_v12  ;;  %v1502_v14 = vld [vmem:[%s2379_s2] ss:$0 sm:$0xff] }
  0x17   :  { %1671 = vmatprep.subr.bf16.mxu0 %v1923_v2  ;;  %v336_v60 = vld [vmem:[%s2388_s11] sm:$0xff] }
  0x18   :  { %1622 = vmatmul.mubr.msk.bf16.gmra.mrb[4].mxu0 %vm114_vm1, %v1774_v6  ;;  %v338_v61 = vpack.c.bf16 %v336_v60, %v336_v60 }
  0x19   :  { %1625 = vmatprep.mubr.msk.bf16.mxu0 %vm1924_vm0, %v1923_v2  ;;  %1640 = vmatpush3.bf16.msra.mxu1 %v1779_v11 }
  0x1a   :  { %1661 = vmatprep.subr.bf16.mxu1 %v1923_v2  ;;  %1672 = vmatpush3.bf16.msra.mxu0 %v2069_v13 }
  0x1b   :  { %1685 = vmatprep.subr.bf16.mxu0 %v1923_v2 }
  0x20   :  { %1626 = vmatmul.mubr.msk.bf16.gmra.mrb[8].mxu0 %vm114_vm1, %v1775_v7 }
  0x21   :  { %1629 = vmatprep.mubr.msk.bf16.mxu0 %vm1924_vm0, %v1923_v2 }
  0x28   :  { %1630 = vmatmul.mubr.msk.bf16.gmra.mrb[12].mxu0 %vm114_vm1, %v1776_v8 }
  0x29   :  { %1633 = vmatprep.mubr.msk.bf16.mxu0 %vm1924_vm0, %v1923_v2 }
  0x30   :  { %1634 = vmatmul.mubr.msk.bf16.gmra.mrb[16].mxu0 %vm114_vm1, %v1777_v9 }
  0x31   :  { %1673 = vmatprep.mubr.msk.bf16.mxu0 %vm1924_vm0, %v1923_v2 }
  0xe3   :  { %v164_v15 = vpop.f32.mrb[0].mxu0 }
  0xe4   :  { %v165_v16 = vadd.f32 %v1502_v14, %v164_v15  ;;  %v1619_v17 = vpop.f32.mrb[1].mxu0 }
  0xe5   :  { %v167_v18 = vpop.f32.mrb[2].mxu0 }
  0xe6   :  { %v168_v19 = vadd.f32 %v1502_v14, %v167_v18  ;;  %v1620_v20 = vpop.f32.mrb[3].mxu0  ;;  %v203_v21 = vmax.f32 %v165_v16, 0.0 }
  0xe8   :  { %v204_v22 = vmax.f32 %v168_v19, 0.0 }
  0xea   :  { %v213_v23 = vpack.c.bf16 %v204_v22, %v203_v21  ;;  %v2124_v21 = vld [vmem:[%s2383_s6] ss:$0 sm:$0xff] }
  0xeb   :  { %v172_v24 = vpop.f32.mrb[4].mxu0 }
  0xec   :  { %v173_v25 = vadd.f32 %v1502_v14, %v172_v24  ;;  %v1623_v26 = vpop.f32.mrb[5].mxu0  ;;  %1642 = vmatmul.mubr.msk.bf16.vlgmr.msra.gmra.mrb[0].mxu1 %vm241_vm2, %v213_v23 }
  0xed   :  { %1662 = vmatpush3.bf16.msra.mxu1 %v2062_v12  ;;  %v175_v27 = vpop.f32.mrb[6].mxu0  ;;  %1645 = vmatprep.mubr.msk.bf16.mxu1 %vm1924_vm0, %v1923_v2 }
  0xee   :  { %v176_v28 = vadd.f32 %v1502_v14, %v175_v27  ;;  %v1624_v29 = vpop.f32.mrb[7].mxu0  ;;  %1663 = vmatprep.subr.bf16.mxu1 %v1923_v2  ;;  %v205_v30 = vmax.f32 %v173_v25, 0.0 }
  0xef   :  { %v337_v29 = vld [vmem:[%s2389_s12] sm:$0xff] }
  0xf0   :  { %v206_v31 = vmax.f32 %v176_v28, 0.0 }
  0xf1   :  { %1664 = vmatpush3.bf16.msra.mxu1 %v2069_v13 }
  0xf2   :  { %v214_v32 = vpack.c.bf16 %v206_v31, %v205_v30  ;;  %1677 = vmatprep.subr.bf16.mxu1 %v1923_v2 }
  0xf3   :  { %v180_v33 = vpop.f32.mrb[8].mxu0 }
  0xf4   :  { %v181_v34 = vadd.f32 %v1502_v14, %v180_v33  ;;  %v1627_v35 = vpop.f32.mrb[9].mxu0  ;;  %1646 = vmatmul.mubr.msk.bf16.gmra.mrb[4].mxu1 %vm241_vm2, %v214_v32 }
  0xf5   :  { %v183_v36 = vpop.f32.mrb[10].mxu0  ;;  %1649 = vmatprep.mubr.msk.bf16.mxu1 %vm1924_vm0, %v1923_v2 }
  0xf6   :  { %v184_v37 = vadd.f32 %v1502_v14, %v183_v36  ;;  %v1628_v38 = vpop.f32.mrb[11].mxu0  ;;  %v207_v39 = vmax.f32 %v181_v34, 0.0 }
  0xf8   :  { %v208_v40 = vmax.f32 %v184_v37, 0.0 }
  0xfa   :  { %v215_v41 = vpack.c.bf16 %v208_v40, %v207_v39 }
  0xfb   :  { %v188_v42 = vpop.f32.mrb[12].mxu0 }
  0xfc   :  { %v189_v43 = vadd.f32 %v1502_v14, %v188_v42  ;;  %v1631_v44 = vpop.f32.mrb[13].mxu0  ;;  %1650 = vmatmul.mubr.msk.bf16.gmra.mrb[8].mxu1 %vm241_vm2, %v215_v41 }
  0xfd   :  { %v191_v45 = vpop.f32.mrb[14].mxu0  ;;  %1653 = vmatprep.mubr.msk.bf16.mxu1 %vm1924_vm0, %v1923_v2 }
  0xfe   :  { %v192_v46 = vadd.f32 %v1502_v14, %v191_v45  ;;  %v1632_v47 = vpop.f32.mrb[15].mxu0  ;;  %v209_v48 = vmax.f32 %v189_v43, 0.0 }
 0x100   :  { %v210_v49 = vmax.f32 %v192_v46, 0.0 }
 0x102   :  { %v216_v50 = vpack.c.bf16 %v210_v49, %v209_v48 }
 0x103   :  { %v196_v51 = vpop.f32.mrb[16].mxu0 }
 0x104   :  { %v197_v52 = vadd.f32 %v1502_v14, %v196_v51  ;;  %v1635_v53 = vpop.f32.mrb[17].mxu0  ;;  %1654 = vmatmul.mubr.msk.bf16.gmra.mrb[12].mxu1 %vm241_vm2, %v216_v50 }
 0x105   :  { %v199_v54 = vpop.f32.mrb[18].mxu0  ;;  %1657 = vmatprep.mubr.msk.bf16.mxu1 %vm1924_vm0, %v1923_v2 }
 0x106   :  { %v200_v55 = vadd.f32 %v1502_v14, %v199_v54  ;;  %v1636_v56 = vpop.f32.mrb[19].mxu0  ;;  %v211_v57 = vmax.f32 %v197_v52, 0.0 }
 0x108   :  { %v212_v58 = vmax.f32 %v200_v55, 0.0 }
 0x10a   :  { %v217_v59 = vpack.c.bf16 %v212_v58, %v211_v57 }
 0x10c   :  { %1658 = vmatmul.mubr.msk.bf16.gmra.mrb[16].mxu1 %vm241_vm2, %v217_v59 }
 0x10d   :  { %1665 = vmatprep.mubr.msk.bf16.mxu1 %vm1924_vm0, %v1923_v2 }
 0x114   :  { %1666 = vmatmul.mubr.msk.bf16.vlgmr.msra.gmra.mrb[20].mxu1 %vm241_vm2, %v338_v61 }
 0x115   :  { %1678 = vmatpush3.bf16.msra.mxu1 %v2062_v12  ;;  %1681 = vmatprep.mubr.msk.bf16.mxu1 %vm1924_vm0, %v1923_v2 }
 0x116   :  { %1679 = vmatprep.subr.bf16.mxu1 %v1923_v2 }
 0x119   :  { %1680 = vmatpush3.bf16.msra.mxu1 %v2069_v13 }
 0x11a   :  { %1693 = vmatprep.subr.bf16.mxu1 %v1923_v2 }
 0x1bf   :  { %v291_v62 = vpop.f32.mrb[0].mxu1 }
 0x1c0   :  { %v1643_v63 = vpop.f32.mrb[1].mxu1  ;;  %v292_v22 = vadd.f32 %v2124_v21, %v291_v62 }
 0x1c1   :  { %v294_v0 = vpop.f32.mrb[2].mxu1 }
 0x1c2   :  { %v1644_v1 = vpop.f32.mrb[3].mxu1  ;;  %v295_v45 = vadd.f32 %v2124_v21, %v294_v0 }
 0x1c7   :  { %v2105_v3 = vpop.f32.mrb[4].mxu1 }
 0x1c8   :  { %v1647_v4 = vpop.f32.mrb[5].mxu1 }
 0x1c9   :  { %v2107_v5 = vpop.f32.mrb[6].mxu1  ;;  %v300_v4 = vadd.f32 %v2124_v21, %v2105_v3 }
 0x1ca   :  { %v1648_v6 = vpop.f32.mrb[7].mxu1 }
 0x1cf   :  { %v2109_v7 = vpop.f32.mrb[8].mxu1 }
 0x1d0   :  { %v1651_v8 = vpop.f32.mrb[9].mxu1 }
 0x1d1   :  { %v2111_v9 = vpop.f32.mrb[10].mxu1 }
 0x1d2   :  { %v1652_v10 = vpop.f32.mrb[11].mxu1 }
 0x1d7   :  { %v2113_v11 = vpop.f32.mrb[12].mxu1 }
 0x1d8   :  { %v1655_v14 = vpop.f32.mrb[13].mxu1 }
 0x1d9   :  { %v2115_v15 = vpop.f32.mrb[14].mxu1 }
 0x1da   :  { %v1656_v16 = vpop.f32.mrb[15].mxu1 }
 0x1df   :  { %v2117_v17 = vpop.f32.mrb[16].mxu1 }
 0x1e0   :  { %v1659_v18 = vpop.f32.mrb[17].mxu1 }
 0x1e1   :  { %v2119_v19 = vpop.f32.mrb[18].mxu1 }
 0x1e2   :  { %v1660_v20 = vpop.f32.mrb[19].mxu1 }
 0x1e7   :  { %v388_v23 = vpop.f32.mrb[20].mxu1 }
 0x1e8   :  { %v394_v24 = vadd.f32 %v388_v23, %v292_v22  ;;  %v1667_v25 = vpop.f32.mrb[21].mxu1 }
 0x1e9   :  { %v391_v26 = vpop.f32.mrb[22].mxu1 }
 0x1ea   :  { %1788 = vtanh.f32 %v394_v24  ;;  %v1668_v27 = vpop.f32.mrb[23].mxu1  ;;  %v1527_v30 = vmul.f32 -1.442695, %v394_v24 }
 0x1ec   :  { %1790 = vpow2.f32 %v1527_v30 }
 0x1f4   :  { %v1789_v28 = vpop.eup %1788 }
 0x1f5   :  { %408 = vrot.lane.b32.xlu0 %v1789_v28, %s1925_s15 }
 0x1f6   :  { %v1791_v31 = vpop.eup %1790 }
 0x1f7   :  { %v398_v32 = vadd.f32 1.0, %v1791_v31 }
 0x1f9   :  { %403 = vrot.lane.b32.xlu0 %v337_v29, %s1926_s18  ;;  %1792 = vrcp.f32 %v398_v32 }
 0x203   :  { %v1793_v33 = vpop.eup %1792 }
 0x267   :  { %v409_v34 = vpop.permute.xlu0 %408 }
 0x268   :  { %v411_v35 = vmul.f32 %v1793_v33, %v409_v34  ;;  %v303_v34 = vadd.f32 %v2124_v21, %v2107_v5 }
 0x26a   :  { %413 = vrot.lane.b32.xlu1 %v411_v35, %s1926_s18 }
 0x26b   :  { %v404_v36 = vpop.permute.xlu0 %403 }
 0x26c   :  { %v406_v37 = vmul.f32 %v1793_v33, %v404_v36 }
 0x2dc   :  { %v414_v38 = vpop.permute.xlu1 %413 }
 0x2dd   :  { %v416_v39 = vadd.f32 %v414_v38, %v406_v37 }
 0x2df   :  { %1794 = vtanh.f32 %v416_v39 }
 0x2e9   :  { %v1795_v40 = vpop.eup %1794 }
 0x2ea   :  { %419 = vrot.lane.b32.xlu1 %v1795_v40, %s1925_s15 }
 0x35c   :  { %v420_v41 = vpop.permute.xlu1 %419 }
 0x35d   :  { %v2134_v42 = vmul.f32 %v1793_v33, %v420_v41 }
 0x35f   :  { %v446_v43 = vpack.c.bf16 %v2134_v42, %v2134_v42 }
 0x361   :  { %448 = vrot.lane.b32.xlu0 %v446_v43, %s1926_s18 }
 0x3d3   :  { %v449_v44 = vpop.permute.xlu0 %448 }
 0x3d4   :  { %1674 = vmatmul.mubr.msk.bf16.vlgmr.msra.gmra.mrb[20].mxu0 %vm241_vm2, %v449_v44 }
 0x3d5   :  { %1686 = vmatpush3.bf16.msra.mxu0 %v2062_v12  ;;  %1689 = vmatprep.mubr.msk.bf16.mxu0 %vm1924_vm0, %v1923_v2 }
 0x3d6   :  { %1687 = vmatprep.subr.bf16.mxu0 %v1923_v2 }
 0x3d9   :  { %1688 = vmatpush3.bf16.msra.mxu0 %v2069_v13 }
 0x3da   :  { %1701 = vmatprep.subr.bf16.mxu0 %v1923_v2 }
 0x4a7   :  { %v487_v46 = vpop.f32.mrb[20].mxu0 }
 0x4a8   :  { %v493_v47 = vadd.f32 %v487_v46, %v295_v45  ;;  %v1675_v48 = vpop.f32.mrb[21].mxu0 }
 0x4a9   :  { %v490_v49 = vpop.f32.mrb[22].mxu0 }
 0x4aa   :  { %1796 = vtanh.f32 %v493_v47  ;;  %v1676_v50 = vpop.f32.mrb[23].mxu0  ;;  %v1531_v52 = vmul.f32 -1.442695, %v493_v47 }
 0x4ac   :  { %1798 = vpow2.f32 %v1531_v52 }
 0x4b4   :  { %v1797_v51 = vpop.eup %1796 }
 0x4b5   :  { %503 = vrot.lane.b32.xlu1 %v1797_v51, %s1925_s15 }
 0x4b6   :  { %v1799_v53 = vpop.eup %1798 }
 0x4b7   :  { %v497_v54 = vadd.f32 1.0, %v1799_v53 }
 0x4b9   :  { %1800 = vrcp.f32 %v497_v54 }
 0x4c3   :  { %v1801_v55 = vpop.eup %1800 }
 0x4c4   :  { %v501_v58 = vmul.f32 %v1801_v55, %v416_v39 }
 0x527   :  { %v504_v56 = vpop.permute.xlu1 %503 }
 0x528   :  { %v506_v57 = vmul.f32 %v1801_v55, %v504_v56 }
 0x52a   :  { %508 = vrot.lane.b32.xlu0 %v506_v57, %s1926_s18 }
 0x59c   :  { %v509_v59 = vpop.permute.xlu0 %508 }
 0x59d   :  { %v511_v60 = vadd.f32 %v509_v59, %v501_v58 }
 0x59f   :  { %1802 = vtanh.f32 %v511_v60 }
 0x5a9   :  { %v1803_v61 = vpop.eup %1802 }
 0x5aa   :  { %514 = vrot.lane.b32.xlu1 %v1803_v61, %s1925_s15 }
 0x61c   :  { %v515_v62 = vpop.permute.xlu1 %514 }
 0x61d   :  { %v2150_v63 = vmul.f32 %v1801_v55, %v515_v62  ;;  %v308_v55 = vadd.f32 %v2124_v21, %v2109_v7 }
 0x61f   :  { %v527_v0 = vpack.c.bf16 %v2150_v63, %v2150_v63 }
 0x621   :  { %529 = vrot.lane.b32.xlu0 %v527_v0, %s1926_s18 }
 0x693   :  { %v530_v1 = vpop.permute.xlu0 %529 }
 0x694   :  { %1682 = vmatmul.mubr.msk.bf16.vlgmr.msra.gmra.mrb[24].mxu1 %vm241_vm2, %v530_v1 }
 0x695   :  { %1694 = vmatpush3.bf16.msra.mxu1 %v2062_v12  ;;  %1697 = vmatprep.mubr.msk.bf16.mxu1 %vm1924_vm0, %v1923_v2 }
 0x696   :  { %1695 = vmatprep.subr.bf16.mxu1 %v1923_v2 }
 0x699   :  { %1696 = vmatpush3.bf16.msra.mxu1 %v2069_v13 }
 0x69a   :  { %1709 = vmatprep.subr.bf16.mxu1 %v1923_v2 }
 0x767   :  { %v568_v6 = vpop.f32.mrb[24].mxu1 }
 0x768   :  { %v574_v8 = vadd.f32 %v568_v6, %v300_v4  ;;  %v1683_v10 = vpop.f32.mrb[25].mxu1 }
 0x769   :  { %v571_v14 = vpop.f32.mrb[26].mxu1 }
 0x76a   :  { %1804 = vtanh.f32 %v574_v8  ;;  %v1684_v16 = vpop.f32.mrb[27].mxu1  ;;  %v1533_v20 = vmul.f32 -1.442695, %v574_v8 }
 0x76c   :  { %1806 = vpow2.f32 %v1533_v20 }
 0x774   :  { %v1805_v18 = vpop.eup %1804 }
 0x775   :  { %584 = vrot.lane.b32.xlu1 %v1805_v18, %s1925_s15 }
 0x776   :  { %v1807_v22 = vpop.eup %1806 }
 0x777   :  { %v578_v23 = vadd.f32 1.0, %v1807_v22 }
 0x779   :  { %1808 = vrcp.f32 %v578_v23 }
 0x783   :  { %v1809_v24 = vpop.eup %1808 }
 0x784   :  { %v582_v3 = vmul.f32 %v1809_v24, %v511_v60 }
 0x7e7   :  { %v585_v25 = vpop.permute.xlu1 %584 }
 0x7e8   :  { %v587_v26 = vmul.f32 %v1809_v24, %v585_v25 }
 0x7ea   :  { %589 = vrot.lane.b32.xlu0 %v587_v26, %s1926_s18 }
 0x85c   :  { %v590_v27 = vpop.permute.xlu0 %589 }
 0x85d   :  { %v592_v28 = vadd.f32 %v590_v27, %v582_v3 }
 0x85f   :  { %1810 = vtanh.f32 %v592_v28 }
 0x869   :  { %v1811_v29 = vpop.eup %1810 }
 0x86a   :  { %595 = vrot.lane.b32.xlu1 %v1811_v29, %s1925_s15 }
 0x8dc   :  { %v596_v30 = vpop.permute.xlu1 %595 }
 0x8dd   :  { %v2167_v31 = vmul.f32 %v1809_v24, %v596_v30  ;;  %v311_v24 = vadd.f32 %v2124_v21, %v2111_v9 }
 0x8df   :  { %v608_v32 = vpack.c.bf16 %v2167_v31, %v2167_v31 }
 0x8e1   :  { %610 = vrot.lane.b32.xlu0 %v608_v32, %s1926_s18 }
 0x953   :  { %v611_v33 = vpop.permute.xlu0 %610 }
 0x954   :  { %1690 = vmatmul.mubr.msk.bf16.vlgmr.msra.gmra.mrb[24].mxu0 %vm241_vm2, %v611_v33 }
 0x955   :  { %1702 = vmatpush3.bf16.msra.mxu0 %v2062_v12  ;;  %1705 = vmatprep.mubr.msk.bf16.mxu0 %vm1924_vm0, %v1923_v2 }
 0x956   :  { %1703 = vmatprep.subr.bf16.mxu0 %v1923_v2 }
 0x959   :  { %1704 = vmatpush3.bf16.msra.mxu0 %v2069_v13 }
 0x95a   :  { %1717 = vmatprep.subr.bf16.mxu0 %v1923_v2 }
 0xa27   :  { %v649_v35 = vpop.f32.mrb[24].mxu0 }
 0xa28   :  { %v655_v36 = vadd.f32 %v649_v35, %v303_v34  ;;  %v1691_v37 = vpop.f32.mrb[25].mxu0 }
 0xa29   :  { %v652_v38 = vpop.f32.mrb[26].mxu0 }
 0xa2a   :  { %1812 = vtanh.f32 %v655_v36  ;;  %v1692_v39 = vpop.f32.mrb[27].mxu0  ;;  %v1535_v41 = vmul.f32 -1.442695, %v655_v36 }
 0xa2c   :  { %1814 = vpow2.f32 %v1535_v41 }
 0xa34   :  { %v1813_v40 = vpop.eup %1812 }
 0xa35   :  { %665 = vrot.lane.b32.xlu1 %v1813_v40, %s1925_s15 }
 0xa36   :  { %v1815_v43 = vpop.eup %1814 }
 0xa37   :  { %v659_v44 = vadd.f32 1.0, %v1815_v43 }
 0xa39   :  { %1816 = vrcp.f32 %v659_v44 }
 0xa43   :  { %v1817_v45 = vpop.eup %1816 }
 0xa44   :  { %v663_v5 = vmul.f32 %v1817_v45, %v592_v28 }
 0xaa7   :  { %v666_v46 = vpop.permute.xlu1 %665 }
 0xaa8   :  { %v668_v47 = vmul.f32 %v1817_v45, %v666_v46 }
 0xaaa   :  { %670 = vrot.lane.b32.xlu0 %v668_v47, %s1926_s18 }
 0xb1c   :  { %v671_v48 = vpop.permute.xlu0 %670 }
 0xb1d   :  { %v673_v49 = vadd.f32 %v671_v48, %v663_v5 }
 0xb1f   :  { %1818 = vtanh.f32 %v673_v49 }
 0xb29   :  { %v1819_v50 = vpop.eup %1818 }
 0xb2a   :  { %676 = vrot.lane.b32.xlu1 %v1819_v50, %s1925_s15 }
 0xb9c   :  { %v677_v51 = vpop.permute.xlu1 %676 }
 0xb9d   :  { %v2184_v52 = vmul.f32 %v1817_v45, %v677_v51  ;;  %v316_v45 = vadd.f32 %v2124_v21, %v2113_v11 }
 0xb9f   :  { %v689_v53 = vpack.c.bf16 %v2184_v52, %v2184_v52 }
 0xba1   :  { %691 = vrot.lane.b32.xlu0 %v689_v53, %s1926_s18 }
 0xc13   :  { %v692_v54 = vpop.permute.xlu0 %691 }
 0xc14   :  { %1698 = vmatmul.mubr.msk.bf16.vlgmr.msra.gmra.mrb[28].mxu1 %vm241_vm2, %v692_v54 }
 0xc15   :  { %1710 = vmatpush3.bf16.msra.mxu1 %v2062_v12  ;;  %1713 = vmatprep.mubr.msk.bf16.mxu1 %vm1924_vm0, %v1923_v2 }
 0xc16   :  { %1711 = vmatprep.subr.bf16.mxu1 %v1923_v2 }
 0xc19   :  { %1712 = vmatpush3.bf16.msra.mxu1 %v2069_v13 }
 0xc1a   :  { %1725 = vmatprep.subr.bf16.mxu1 %v1923_v2 }
 0xce7   :  { %v730_v56 = vpop.f32.mrb[28].mxu1 }
 0xce8   :  { %v736_v57 = vadd.f32 %v730_v56, %v308_v55  ;;  %v1699_v58 = vpop.f32.mrb[29].mxu1 }
 0xce9   :  { %v733_v59 = vpop.f32.mrb[30].mxu1 }
 0xcea   :  { %1820 = vtanh.f32 %v736_v57  ;;  %v1700_v60 = vpop.f32.mrb[31].mxu1  ;;  %v1537_v62 = vmul.f32 -1.442695, %v736_v57 }
 0xcec   :  { %1822 = vpow2.f32 %v1537_v62 }
 0xcf4   :  { %v1821_v61 = vpop.eup %1820 }
 0xcf5   :  { %746 = vrot.lane.b32.xlu1 %v1821_v61, %s1925_s15 }
 0xcf6   :  { %v1823_v0 = vpop.eup %1822 }
 0xcf7   :  { %v740_v1 = vadd.f32 1.0, %v1823_v0 }
 0xcf9   :  { %1824 = vrcp.f32 %v740_v1 }
 0xd03   :  { %v1825_v4 = vpop.eup %1824 }
 0xd04   :  { %v744_v7 = vmul.f32 %v1825_v4, %v673_v49 }
 0xd67   :  { %v747_v6 = vpop.permute.xlu1 %746 }
 0xd68   :  { %v749_v8 = vmul.f32 %v1825_v4, %v747_v6 }
 0xd6a   :  { %751 = vrot.lane.b32.xlu0 %v749_v8, %s1926_s18 }
 0xddc   :  { %v752_v10 = vpop.permute.xlu0 %751 }
 0xddd   :  { %v754_v14 = vadd.f32 %v752_v10, %v744_v7 }
 0xddf   :  { %1826 = vtanh.f32 %v754_v14 }
 0xde9   :  { %v1827_v16 = vpop.eup %1826 }
 0xdea   :  { %757 = vrot.lane.b32.xlu1 %v1827_v16, %s1925_s15 }
 0xe5c   :  { %v758_v18 = vpop.permute.xlu1 %757 }
 0xe5d   :  { %v2201_v20 = vmul.f32 %v1825_v4, %v758_v18  ;;  %v319_v4 = vadd.f32 %v2124_v21, %v2115_v15 }
 0xe5f   :  { %v770_v22 = vpack.c.bf16 %v2201_v20, %v2201_v20 }
 0xe61   :  { %772 = vrot.lane.b32.xlu0 %v770_v22, %s1926_s18 }
 0xed3   :  { %v773_v23 = vpop.permute.xlu0 %772 }
 0xed4   :  { %1706 = vmatmul.mubr.msk.bf16.vlgmr.msra.gmra.mrb[28].mxu0 %vm241_vm2, %v773_v23 }
 0xed5   :  { %1718 = vmatpush3.bf16.msra.mxu0 %v2062_v12  ;;  %1721 = vmatprep.mubr.msk.bf16.mxu0 %vm1924_vm0, %v1923_v2 }
 0xed6   :  { %1719 = vmatprep.subr.bf16.mxu0 %v1923_v2 }
 0xed9   :  { %1720 = vmatpush3.bf16.msra.mxu0 %v2069_v13 }
 0xeda   :  { %1733 = vmatprep.subr.bf16.mxu0 %v1923_v2 }
 0xfa7   :  { %v811_v25 = vpop.f32.mrb[28].mxu0 }
 0xfa8   :  { %v817_v26 = vadd.f32 %v811_v25, %v311_v24  ;;  %v1707_v3 = vpop.f32.mrb[29].mxu0 }
 0xfa9   :  { %v814_v27 = vpop.f32.mrb[30].mxu0 }
 0xfaa   :  { %1828 = vtanh.f32 %v817_v26  ;;  %v1708_v28 = vpop.f32.mrb[31].mxu0  ;;  %v1539_v30 = vmul.f32 -1.442695, %v817_v26 }
 0xfac   :  { %1830 = vpow2.f32 %v1539_v30 }
 0xfb4   :  { %v1829_v29 = vpop.eup %1828 }
 0xfb5   :  { %827 = vrot.lane.b32.xlu1 %v1829_v29, %s1925_s15 }
 0xfb6   :  { %v1831_v32 = vpop.eup %1830 }
 0xfb7   :  { %v821_v33 = vadd.f32 1.0, %v1831_v32  ;;  %v324_v32 = vadd.f32 %v2124_v21, %v2117_v17 }
 0xfb9   :  { %1832 = vrcp.f32 %v821_v33 }
 0xfc3   :  { %v1833_v34 = vpop.eup %1832 }
 0xfc4   :  { %v825_v9 = vmul.f32 %v1833_v34, %v754_v14 }
0x1027   :  { %v828_v35 = vpop.permute.xlu1 %827 }
0x1028   :  { %v830_v36 = vmul.f32 %v1833_v34, %v828_v35 }
0x102a   :  { %832 = vrot.lane.b32.xlu0 %v830_v36, %s1926_s18 }
0x109c   :  { %v833_v37 = vpop.permute.xlu0 %832 }
0x109d   :  { %v835_v38 = vadd.f32 %v833_v37, %v825_v9 }
0x109f   :  { %1834 = vtanh.f32 %v835_v38 }
0x10a9   :  { %v1835_v39 = vpop.eup %1834 }
0x10aa   :  { %838 = vrot.lane.b32.xlu1 %v1835_v39, %s1925_s15 }
0x111c   :  { %v839_v40 = vpop.permute.xlu1 %838 }
0x111d   :  { %v2218_v41 = vmul.f32 %v1833_v34, %v839_v40 }
0x111f   :  { %v851_v43 = vpack.c.bf16 %v2218_v41, %v2218_v41 }
0x1121   :  { %853 = vrot.lane.b32.xlu0 %v851_v43, %s1926_s18 }
0x1193   :  { %v854_v44 = vpop.permute.xlu0 %853 }
0x1194   :  { %1714 = vmatmul.mubr.msk.bf16.vlgmr.msra.gmra.mrb[32].mxu1 %vm241_vm2, %v854_v44 }
0x1195   :  { %1726 = vmatpush3.bf16.msra.mxu1 %v2062_v12  ;;  %1729 = vmatprep.mubr.msk.bf16.mxu1 %vm1924_vm0, %v1923_v2 }
0x1196   :  { %1727 = vmatprep.subr.bf16.mxu1 %v1923_v2 }
0x1199   :  { %1728 = vmatpush3.bf16.msra.mxu1 %v2069_v13 }
0x119a   :  { %1741 = vmatprep.subr.bf16.mxu1 %v1923_v2 }
0x1267   :  { %v892_v46 = vpop.f32.mrb[32].mxu1 }
0x1268   :  { %v898_v47 = vadd.f32 %v892_v46, %v316_v45  ;;  %v1715_v5 = vpop.f32.mrb[33].mxu1 }
0x1269   :  { %v895_v48 = vpop.f32.mrb[34].mxu1 }
0x126a   :  { %1836 = vtanh.f32 %v898_v47  ;;  %v1716_v49 = vpop.f32.mrb[35].mxu1  ;;  %v1541_v51 = vmul.f32 -1.442695, %v898_v47 }
0x126c   :  { %1838 = vpow2.f32 %v1541_v51 }
0x1274   :  { %v1837_v50 = vpop.eup %1836 }
0x1275   :  { %908 = vrot.lane.b32.xlu1 %v1837_v50, %s1925_s15 }
0x1276   :  { %v1839_v53 = vpop.eup %1838 }
0x1277   :  { %v902_v54 = vadd.f32 1.0, %v1839_v53  ;;  %v327_v53 = vadd.f32 %v2124_v21, %v2119_v19 }
0x1279   :  { %1840 = vrcp.f32 %v902_v54 }
0x1283   :  { %v1841_v55 = vpop.eup %1840 }
0x1284   :  { %v906_v11 = vmul.f32 %v1841_v55, %v835_v38 }
0x12e7   :  { %v909_v56 = vpop.permute.xlu1 %908 }
0x12e8   :  { %v911_v57 = vmul.f32 %v1841_v55, %v909_v56 }
0x12ea   :  { %913 = vrot.lane.b32.xlu0 %v911_v57, %s1926_s18 }
0x135c   :  { %v914_v58 = vpop.permute.xlu0 %913 }
0x135d   :  { %v916_v59 = vadd.f32 %v914_v58, %v906_v11 }
0x135f   :  { %1842 = vtanh.f32 %v916_v59 }
0x1369   :  { %v1843_v60 = vpop.eup %1842 }
0x136a   :  { %919 = vrot.lane.b32.xlu1 %v1843_v60, %s1925_s15 }
0x13dc   :  { %v920_v61 = vpop.permute.xlu1 %919 }
0x13dd   :  { %v2235_v62 = vmul.f32 %v1841_v55, %v920_v61 }
0x13df   :  { %v932_v0 = vpack.c.bf16 %v2235_v62, %v2235_v62 }
0x13e1   :  { %934 = vrot.lane.b32.xlu0 %v932_v0, %s1926_s18 }
0x1453   :  { %v935_v1 = vpop.permute.xlu0 %934 }
0x1454   :  { %1722 = vmatmul.mubr.msk.bf16.vlgmr.msra.gmra.mrb[32].mxu0 %vm241_vm2, %v935_v1 }
0x1455   :  { %1734 = vmatpush3.bf16.msra.mxu0 %v2062_v12  ;;  %1737 = vmatprep.mubr.msk.bf16.mxu0 %vm1924_vm0, %v1923_v2 }
0x1456   :  { %1735 = vmatprep.subr.bf16.mxu0 %v1923_v2 }
0x1459   :  { %1736 = vmatpush3.bf16.msra.mxu0 %v2069_v13 }
0x145a   :  { %1753 = vmatprep.subr.bf16.mxu0 %v1923_v2 }
0x1527   :  { %v973_v6 = vpop.f32.mrb[32].mxu0 }
0x1528   :  { %v979_v8 = vadd.f32 %v973_v6, %v319_v4  ;;  %v1723_v7 = vpop.f32.mrb[33].mxu0 }
0x1529   :  { %v976_v10 = vpop.f32.mrb[34].mxu0 }
0x152a   :  { %1844 = vtanh.f32 %v979_v8  ;;  %v1724_v14 = vpop.f32.mrb[35].mxu0  ;;  %v1543_v12 = vmul.f32 -1.442695, %v979_v8 }
0x152c   :  { %1846 = vpow2.f32 %v1543_v12 }
0x1534   :  { %v1845_v16 = vpop.eup %1844 }
0x1535   :  { %989 = vrot.lane.b32.xlu1 %v1845_v16, %s1925_s15 }
0x1536   :  { %v1847_v18 = vpop.eup %1846 }
0x1537   :  { %v983_v22 = vadd.f32 1.0, %v1847_v18 }
0x1539   :  { %1848 = vrcp.f32 %v983_v22 }
0x1543   :  { %v1849_v13 = vpop.eup %1848 }
0x1544   :  { %v987_v15 = vmul.f32 %v1849_v13, %v916_v59  ;;  %v1528_v59 = vld [vmem:[%s2384_s7] ss:$0 sm:$0xff] }
0x15a7   :  { %v990_v23 = vpop.permute.xlu1 %989 }
0x15a8   :  { %v992_v24 = vmul.f32 %v1849_v13, %v990_v23 }
0x15aa   :  { %994 = vrot.lane.b32.xlu0 %v992_v24, %s1926_s18 }
0x161c   :  { %v995_v25 = vpop.permute.xlu0 %994 }
0x161d   :  { %v997_v26 = vadd.f32 %v995_v25, %v987_v15 }
0x161f   :  { %1850 = vtanh.f32 %v997_v26 }
0x1629   :  { %v1851_v3 = vpop.eup %1850 }
0x162a   :  { %1000 = vrot.lane.b32.xlu1 %v1851_v3, %s1925_s15 }
0x169c   :  { %v1001_v27 = vpop.permute.xlu1 %1000 }
0x169d   :  { %v2252_v28 = vmul.f32 %v1849_v13, %v1001_v27 }
0x169f   :  { %v1013_v29 = vpack.c.bf16 %v2252_v28, %v2252_v28 }
0x16a1   :  { %1015 = vrot.lane.b32.xlu0 %v1013_v29, %s1926_s18 }
0x1713   :  { %v1016_v30 = vpop.permute.xlu0 %1015 }
0x1714   :  { %1730 = vmatmul.mubr.msk.bf16.vlgmr.msra.gmra.mrb[36].mxu1 %vm241_vm2, %v1016_v30 }
0x1715   :  { %1749 = vmatprep.mubr.msk.bf16.mxu1 %vm1924_vm0, %v1923_v2 }
0x17e7   :  { %v1054_v33 = vpop.f32.mrb[36].mxu1 }
0x17e8   :  { %v1060_v34 = vadd.f32 %v1054_v33, %v324_v32  ;;  %v1731_v35 = vpop.f32.mrb[37].mxu1 }
0x17e9   :  { %v1057_v36 = vpop.f32.mrb[38].mxu1 }
0x17ea   :  { %1852 = vtanh.f32 %v1060_v34  ;;  %v1732_v9 = vpop.f32.mrb[39].mxu1  ;;  %v1545_v38 = vmul.f32 -1.442695, %v1060_v34 }
0x17ec   :  { %1854 = vpow2.f32 %v1545_v38 }
0x17f4   :  { %v1853_v37 = vpop.eup %1852 }
0x17f5   :  { %1070 = vrot.lane.b32.xlu1 %v1853_v37, %s1925_s15 }
0x17f6   :  { %v1855_v39 = vpop.eup %1854 }
0x17f7   :  { %v1064_v40 = vadd.f32 1.0, %v1855_v39 }
0x17f9   :  { %1856 = vrcp.f32 %v1064_v40 }
0x1803   :  { %v1857_v43 = vpop.eup %1856 }
0x1804   :  { %v1068_v17 = vmul.f32 %v1857_v43, %v997_v26 }
0x1867   :  { %v1071_v44 = vpop.permute.xlu1 %1070 }
0x1868   :  { %v1073_v45 = vmul.f32 %v1857_v43, %v1071_v44 }
0x186a   :  { %1075 = vrot.lane.b32.xlu0 %v1073_v45, %s1926_s18 }
0x18dc   :  { %v1076_v46 = vpop.permute.xlu0 %1075 }
0x18dd   :  { %v1078_v47 = vadd.f32 %v1076_v46, %v1068_v17 }
0x18df   :  { %1858 = vtanh.f32 %v1078_v47 }
0x18e9   :  { %v1859_v5 = vpop.eup %1858 }
0x18ea   :  { %1081 = vrot.lane.b32.xlu1 %v1859_v5, %s1925_s15 }
0x195c   :  { %v1082_v48 = vpop.permute.xlu1 %1081 }
0x195d   :  { %v2265_v49 = vmul.f32 %v1857_v43, %v1082_v48  ;;  %v1928_v48 = vmov 0  }
0x195e   :  { %1769 = vset.pattern.permute.xlu1 %v1928_v48  ;;  %1768 = vset.pattern.permute.xlu0 %v1928_v48 }
0x195f   :  { %v1094_v50 = vpack.c.bf16 %v2265_v49, %v2265_v49 }
0x1961   :  { %1096 = vrot.lane.b32.xlu0 %v1094_v50, %s1926_s18 }
0x19d3   :  { %v1097_v51 = vpop.permute.xlu0 %1096 }
0x19d4   :  { %1738 = vmatmul.mubr.msk.bf16.vlgmr.msra.gmra.mrb[36].mxu0 %vm241_vm2, %v1097_v51  ;;  %v1529_v51 = vld [vmem:[#allocation2] ss:$0 sm:$0xff] }
0x19d5   :  { %1757 = vmatprep.mubr.msk.bf16.mxu0 %vm1924_vm0, %v1923_v2 }
0x1aa7   :  { %v1135_v54 = vpop.f32.mrb[36].mxu0 }
0x1aa8   :  { %v1141_v55 = vadd.f32 %v1135_v54, %v327_v53  ;;  %v1739_v56 = vpop.f32.mrb[37].mxu0 }
0x1aa9   :  { %v1138_v57 = vpop.f32.mrb[38].mxu0 }
0x1aaa   :  { %1860 = vtanh.f32 %v1141_v55  ;;  %v1740_v11 = vpop.f32.mrb[39].mxu0  ;;  %v1547_v60 = vmul.f32 -1.442695, %v1141_v55 }
0x1aac   :  { %1862 = vpow2.f32 %v1547_v60 }
0x1ab4   :  { %v1861_v58 = vpop.eup %1860 }
0x1ab5   :  { %1151 = vrot.lane.b32.xlu1 %v1861_v58, %s1925_s15 }
0x1ab6   :  { %v1863_v61 = vpop.eup %1862 }
0x1ab7   :  { %v1145_v0 = vadd.f32 1.0, %v1863_v61 }
0x1ab9   :  { %428 = vrot.lane.b32.xlu1 %v1528_v59, %s1927_s19  ;;  %1864 = vrcp.f32 %v1145_v0 }
0x1ac3   :  { %v1865_v19 = vpop.eup %1864 }
0x1ac4   :  { %v1149_v16 = vmul.f32 %v1865_v19, %v1078_v47 }
0x1b27   :  { %v1152_v21 = vpop.permute.xlu1 %1151 }
0x1b28   :  { %v1154_v1 = vmul.f32 %v1865_v19, %v1152_v21 }
0x1b2a   :  { %1156 = vrot.lane.b32.xlu0 %v1154_v1, %s1926_s18 }
0x1b2b   :  { %v429_v4 = vpop.permute.xlu1 %428 }
0x1b2c   :  { %v431_v6 = vmul.f32 %v429_v4, %v2134_v42  ;;  %v599_v8 = vmul.f32 %v2167_v31, %v429_v4  ;;  %v761_v7 = vmul.f32 %v2201_v20, %v429_v4  ;;  %v923_v10 = vmul.f32 %v2235_v62, %v429_v4 }
0x1b2d   :  { %v1085_v14 = vmul.f32 %v2265_v49, %v429_v4  ;;  %v518_v24 = vmul.f32 %v2150_v63, %v429_v4  ;;  %v680_v15 = vmul.f32 %v2184_v52, %v429_v4  ;;  %v842_v25 = vmul.f32 %v2218_v41, %v429_v4 }
0x1b2e   :  { %433 = vrot.lane.b32.xlu1 %v431_v6, %s1926_s18  ;;  %v1004_v26 = vmul.f32 %v2252_v28, %v429_v4 }
0x1b32   :  { %601 = vrot.lane.b32.xlu1 %v599_v8, %s1926_s18 }
0x1b36   :  { %763 = vrot.lane.b32.xlu1 %v761_v7, %s1926_s18 }
0x1b3a   :  { %925 = vrot.lane.b32.xlu1 %v923_v10, %s1926_s18 }
0x1b3e   :  { %1087 = vrot.lane.b32.xlu1 %v1085_v14, %s1926_s18 }
0x1b9c   :  { %v1157_v12 = vpop.permute.xlu0 %1156 }
0x1b9d   :  { %v2290_v18 = vadd.f32 %v1157_v12, %v1149_v16 }
0x1b9f   :  { %1866 = vtanh.f32 %v2290_v18 }
0x1ba0   :  { %v434_v22 = vpop.permute.xlu1 %433 }
0x1ba1   :  { %v436_v13 = vsel %vm241_vm2, %v434_v22, 0.0 }
0x1ba2   :  { %437 = vadd.xlane.f32.xlu1 %v436_v13 }
0x1ba4   :  { %v602_v37 = vpop.permute.xlu1 %601 }
0x1ba5   :  { %v604_v40 = vsel %vm241_vm2, %v602_v37, 0.0 }
0x1ba8   :  { %v764_v39 = vpop.permute.xlu1 %763 }
0x1ba9   :  { %v1867_v23 = vpop.eup %1866  ;;  %v766_v44 = vsel %vm241_vm2, %v764_v39, 0.0 }
0x1baa   :  { %1162 = vrot.lane.b32.xlu0 %v1867_v23, %s1925_s15 }
0x1bac   :  { %v926_v43 = vpop.permute.xlu1 %925 }
0x1bad   :  { %v928_v45 = vsel %vm241_vm2, %v926_v43, 0.0 }
0x1bae   :  { %520 = vrot.lane.b32.xlu0 %v518_v24, %s1926_s18 }
0x1bb0   :  { %v1088_v17 = vpop.permute.xlu1 %1087 }
0x1bb1   :  { %v1090_v46 = vsel %vm241_vm2, %v1088_v17, 0.0 }
0x1bb2   :  { %682 = vrot.lane.b32.xlu0 %v680_v15, %s1926_s18 }
0x1bb6   :  { %844 = vrot.lane.b32.xlu0 %v842_v25, %s1926_s18 }
0x1bba   :  { %1006 = vrot.lane.b32.xlu0 %v1004_v26, %s1926_s18 }
0x1c1c   :  { %v1163_v3 = vpop.permute.xlu0 %1162 }
0x1c1d   :  { %v2303_v27 = vmul.f32 %v1865_v19, %v1163_v3 }
0x1c1f   :  { %v1166_v29 = vmul.f32 %v2303_v27, %v429_v4 }
0x1c20   :  { %v521_v30 = vpop.permute.xlu0 %520 }
0x1c21   :  { %1168 = vrot.lane.b32.xlu0 %v1166_v29, %s1926_s18  ;;  %v523_v38 = vsel %vm241_vm2, %v521_v30, 0.0 }
0x1c24   :  { %v683_v32 = vpop.permute.xlu0 %682 }
0x1c25   :  { %v685_v33 = vsel %vm241_vm2, %v683_v32, 0.0 }
0x1c26   :  { %686 = vadd.xlane.f32.xlu1 %v685_v33 }
0x1c28   :  { %v845_v34 = vpop.permute.xlu0 %844 }
0x1c29   :  { %v847_v35 = vsel %vm241_vm2, %v845_v34, 0.0 }
0x1c2a   :  { %848 = vadd.xlane.f32.xlu1 %v847_v35 }
0x1c2c   :  { %v1007_v36 = vpop.permute.xlu0 %1006 }
0x1c2d   :  { %v1009_v9 = vsel %vm241_vm2, %v1007_v36, 0.0 }
0x1c2e   :  { %1010 = vadd.xlane.f32.xlu1 %v1009_v9 }
0x1c2f   :  { %v438_v53 = vpop.xlane.xlu1 %437 }
0x1c30   :  { %v445_v56 = vadd.f32 %v1529_v51, %v438_v53 }
0x1c40   :  { %524 = vadd.xlane.f32.xlu0 %v523_v38 }
0x1c44   :  { %605 = vadd.xlane.f32.xlu0 %v604_v40 }
0x1c48   :  { %767 = vadd.xlane.f32.xlu0 %v766_v44 }
0x1c4c   :  { %929 = vadd.xlane.f32.xlu0 %v928_v45 }
0x1c50   :  { %1091 = vadd.xlane.f32.xlu0 %v1090_v46 }
0x1c93   :  { %v1169_v47 = vpop.permute.xlu0 %1168 }
0x1c94   :  { %v1171_v5 = vsel %vm241_vm2, %v1169_v47, 0.0 }
0x1c95   :  { %1172 = vadd.xlane.f32.xlu1 %v1171_v5 }
0x1cb3   :  { %v687_v58 = vpop.xlane.xlu1 %686 }
0x1cb4   :  { %v688_v61 = vadd.f32 %v1529_v51, %v687_v58 }
0x1cb7   :  { %v849_v21 = vpop.xlane.xlu1 %848 }
0x1cb8   :  { %v850_v6 = vadd.f32 %v1529_v51, %v849_v21 }
0x1cbb   :  { %v1011_v10 = vpop.xlane.xlu1 %1010 }
0x1cbc   :  { %v1012_v12 = vadd.f32 %v1529_v51, %v1011_v10 }
0x1ccd   :  { %v525_v50 = vpop.xlane.xlu0 %524 }
0x1cce   :  { %v526_v55 = vadd.f32 %v1529_v51, %v525_v50 }
0x1cd0   :  { %v1175_v11 = vmax.f32 %v445_v56, %v526_v55 }
0x1cd1   :  { %v606_v54 = vpop.xlane.xlu0 %605 }
0x1cd2   :  { %v607_v57 = vadd.f32 %v1529_v51, %v606_v54 }
0x1cd4   :  { %v1176_v59 = vmax.f32 %v1175_v11, %v607_v57 }
0x1cd5   :  { %v768_v60 = vpop.xlane.xlu0 %767 }
0x1cd6   :  { %v1177_v0 = vmax.f32 %v1176_v59, %v688_v61  ;;  %v769_v19 = vadd.f32 %v1529_v51, %v768_v60 }
0x1cd8   :  { %v1178_v1 = vmax.f32 %v1177_v0, %v769_v19 }
0x1cd9   :  { %v930_v4 = vpop.xlane.xlu0 %929 }
0x1cda   :  { %v1179_v8 = vmax.f32 %v1178_v1, %v850_v6  ;;  %v931_v7 = vadd.f32 %v1529_v51, %v930_v4 }
0x1cdc   :  { %v1180_v14 = vmax.f32 %v1179_v8, %v931_v7 }
0x1cdd   :  { %v1092_v16 = vpop.xlane.xlu0 %1091 }
0x1cde   :  { %v1181_v22 = vmax.f32 %v1180_v14, %v1012_v12  ;;  %v1093_v13 = vadd.f32 %v1529_v51, %v1092_v16 }
0x1ce0   :  { %v1182_v24 = vmax.f32 %v1181_v22, %v1093_v13 }
0x1d22   :  { %v1173_v23 = vpop.xlane.xlu1 %1172 }
0x1d23   :  { %v1174_v15 = vadd.f32 %v1529_v51, %v1173_v23 }
0x1d25   :  { %v1183_v25 = vmax.f32 %v1182_v24, %v1174_v15 }
0x1d27   :  { %v1184_v26 = vsub.f32 %v445_v56, %v1183_v25  ;;  %v1187_v3 = vsub.f32 %v526_v55, %v1183_v25  ;;  %v1190_v29 = vsub.f32 %v607_v57, %v1183_v25  ;;  %v1193_v30 = vsub.f32 %v688_v61, %v1183_v25 }
0x1d28   :  { %v1196_v35 = vsub.f32 %v769_v19, %v1183_v25  ;;  %v1199_v9 = vsub.f32 %v850_v6, %v1183_v25  ;;  %v1202_v38 = vsub.f32 %v931_v7, %v1183_v25  ;;  %v1205_v40 = vsub.f32 %v1012_v12, %v1183_v25 }
0x1d29   :  { %v1185_v32 = vmul.f32 1.442695, %v1184_v26  ;;  %v1188_v33 = vmul.f32 1.442695, %v1187_v3  ;;  %v1191_v34 = vmul.f32 1.442695, %v1190_v29  ;;  %v1208_v44 = vsub.f32 %v1093_v13, %v1183_v25 }
0x1d2a   :  { %v1194_v36 = vmul.f32 1.442695, %v1193_v30  ;;  %v1197_v37 = vmul.f32 1.442695, %v1196_v35  ;;  %v1200_v39 = vmul.f32 1.442695, %v1199_v9  ;;  %v1211_v17 = vsub.f32 %v1174_v15, %v1183_v25 }
0x1d2b   :  { %1868 = vpow2.f32 %v1185_v32  ;;  %v1203_v43 = vmul.f32 1.442695, %v1202_v38  ;;  %v1206_v45 = vmul.f32 1.442695, %v1205_v40  ;;  %v1209_v5 = vmul.f32 1.442695, %v1208_v44 }
0x1d2c   :  { %1870 = vpow2.f32 %v1188_v33  ;;  %v1212_v51 = vmul.f32 1.442695, %v1211_v17  ;;  %v1782_v15 = vld [vmem:[%s2382_s5] sm:$0xff]   ;;  %v1783_v25 = vld [vmem:[%s2382_s5 + $0x8] sm:$0xff]   ;;  %v1784_v26 = vld [vmem:[%s2382_s5 + $0x10] sm:$0xff]  }
0x1d2d   :  { %1872 = vpow2.f32 %v1191_v34  ;;  %1742 = vmatpush3.bf16.msra.mxu1 %v1782_v15 }
0x1d2e   :  { %1874 = vpow2.f32 %v1194_v36  ;;  %1743 = vmatprep.subr.bf16.mxu1 %v1923_v2 }
0x1d2f   :  { %1876 = vpow2.f32 %v1197_v37 }
0x1d30   :  { %1878 = vpow2.f32 %v1200_v39 }
0x1d31   :  { %1880 = vpow2.f32 %v1203_v43  ;;  %1744 = vmatpush3.bf16.msra.mxu1 %v1783_v25 }
0x1d32   :  { %1882 = vpow2.f32 %v1206_v45  ;;  %1745 = vmatprep.subr.bf16.mxu1 %v1923_v2 }
0x1d33   :  { %1884 = vpow2.f32 %v1209_v5 }
0x1d34   :  { %1886 = vpow2.f32 %v1212_v51 }
0x1d35   :  { %v1869_v46 = vpop.eup %1868  ;;  %1746 = vmatpush3.bf16.msra.mxu1 %v1784_v26 }
0x1d36   :  { %v1871_v47 = vpop.eup %1870  ;;  %1747 = vmatprep.subr.bf16.mxu1 %v1923_v2 }
0x1d37   :  { %v1214_v48 = vadd.f32 %v1871_v47, %v1869_v46  ;;  %v1873_v50 = vpop.eup %1872 }
0x1d38   :  { %v1875_v54 = vpop.eup %1874 }
0x1d39   :  { %v1215_v53 = vadd.f32 %v1873_v50, %v1214_v48  ;;  %v1877_v56 = vpop.eup %1876 }
0x1d3a   :  { %v1879_v11 = vpop.eup %1878 }
0x1d3b   :  { %v1216_v55 = vadd.f32 %v1875_v54, %v1215_v53  ;;  %v1881_v59 = vpop.eup %1880 }
0x1d3c   :  { %v1883_v61 = vpop.eup %1882 }
0x1d3d   :  { %v1217_v57 = vadd.f32 %v1877_v56, %v1216_v55  ;;  %v1885_v19 = vpop.eup %1884 }
0x1d3e   :  { %v1887_v1 = vpop.eup %1886 }
0x1d3f   :  { %v1218_v58 = vadd.f32 %v1879_v11, %v1217_v57 }
0x1d41   :  { %v1219_v60 = vadd.f32 %v1881_v59, %v1218_v58 }
0x1d43   :  { %v1220_v0 = vadd.f32 %v1883_v61, %v1219_v60 }
0x1d45   :  { %v1221_v21 = vadd.f32 %v1885_v19, %v1220_v0 }
0x1d47   :  { %v1222_v4 = vadd.f32 %v1887_v1, %v1221_v21 }
0x1d49   :  { %1888 = vrcp.f32 %v1222_v4 }
0x1d53   :  { %v1889_v6 = vpop.eup %1888 }
0x1d54   :  { %v1233_v8 = vmul.f32 %v1889_v6, %v1871_v47  ;;  %v1225_v7 = vmul.f32 %v1889_v6, %v1869_v46  ;;  %v1241_v10 = vmul.f32 %v1889_v6, %v1873_v50  ;;  %v1297_v14 = vmul.f32 %v1889_v6, %v1887_v1 }
0x1d55   :  { %v1249_v16 = vmul.f32 %v1889_v6, %v1875_v54  ;;  %v1257_v12 = vmul.f32 %v1889_v6, %v1877_v56  ;;  %v1265_v22 = vmul.f32 %v1889_v6, %v1879_v11  ;;  %v1273_v13 = vmul.f32 %v1889_v6, %v1881_v59 }
0x1d56   :  { %1236 = vperm.xlu1 %1769, %v1233_v8   ;;  %1228 = vperm.xlu0 %1768, %v1225_v7   ;;  %v1281_v23 = vmul.f32 %v1889_v6, %v1883_v61  ;;  %v1289_v24 = vmul.f32 %v1889_v6, %v1885_v19 }
0x1d5a   :  { %1244 = vperm.xlu1 %1769, %v1241_v10   ;;  %1300 = vperm.xlu0 %1768, %v1297_v14   ;;  %v1786_v10 = vld [vmem:[%s2386_s9] sm:$0xff]   ;;  %v1787_v14 = vld [vmem:[%s2386_s9 + $0x8] sm:$0xff]   ;;  %s1494_s9 = sshll.u32 %s1929_s8, 4  ;;  %s1495_s9 = int_to_ptr.vmem [resolvable:$true] %s1494_s9 }
0x1d5b   :  { %1754 = vmatpush3.bf16.msra.mxu0 %v1786_v10  ;;  %s1899_s2 = scalar_lea.vmem %s1495_s9, 128  ;;  %p1904_p1 = scmp.lt.s32.totalorder %s1495_s9, %s1495_s9 }
0x1d5c   :  { %1755 = vmatprep.subr.bf16.mxu0 %v1923_v2  ;;  %p1900_p0 = scmp.ne.s32.totalorder %s1495_s9, %s1899_s2  ;;  %p1905_p2 = scmp.lt.s32.totalorder %s1899_s2, %s1899_s2 }
0x1d5e   :  { %1252 = vperm.xlu1 %1769, %v1249_v16   ;;  %1311 = vrot.lane.b32.xlu0 %v2303_v27, %s1925_s15  ;;  %p1906_p3 = por %p1905_p2, %p1904_p1 }
0x1d5f   :  { %1756 = vmatpush3.bf16.msra.mxu0 %v1787_v14 }
0x1d60   :  { %p1907_p4 = pnand %p1906_p3, %p1900_p0 }
0x1d62   :  { %1260 = vperm.xlu1 %1769, %v1257_v12  }
0x1d66   :  { %1268 = vperm.xlu1 %1769, %v1265_v22  }
0x1d6a   :  { %1276 = vperm.xlu1 %1769, %v1273_v13  }
0x1d6e   :  { %1284 = vperm.xlu1 %1769, %v1281_v23   ;;  %v1554_v23 = vld [vmem:[%s2387_s10] ss:$0 sm:$0xff] }
0x1d72   :  { %1292 = vperm.xlu1 %1769, %v1289_v24  }
0x1dd5   :  { %v1237_v3 = vpop.permute.xlu1 %1236  ;;  %v1229_v32 = vpop.permute.xlu0 %1228 }
0x1dd6   :  { %v1239_v34 = vmul.f32 %v1237_v3, %v2150_v63  ;;  %v1231_v35 = vmul.f32 %v1229_v32, %v2134_v42 }
0x1dd8   :  { %v1240_v37 = vadd.f32 %v1239_v34, %v1231_v35 }
0x1dd9   :  { %v1245_v29 = vpop.permute.xlu1 %1244 }
0x1dda   :  { %v1247_v36 = vmul.f32 %v1245_v29, %v2167_v31  ;;  %v1785_v31 = vld [vmem:[%s2382_s5 + $0x18] sm:$0xff]  }
0x1ddb   :  { %1748 = vmatpush3.bf16.msra.mxu1 %v1785_v31 }
0x1ddc   :  { %v1248_v39 = vadd.f32 %v1247_v36, %v1240_v37 }
0x1ddd   :  { %v1253_v30 = vpop.permute.xlu1 %1252 }
0x1dde   :  { %v1255_v38 = vmul.f32 %v1253_v30, %v2184_v52  ;;  %v1301_v52 = vpop.permute.xlu0 %1300 }
0x1de0   :  { %v1256_v44 = vadd.f32 %v1255_v38, %v1248_v39 }
0x1de1   :  { %v1261_v33 = vpop.permute.xlu1 %1260 }
0x1de2   :  { %v1263_v40 = vmul.f32 %v1261_v33, %v2201_v20 }
0x1de4   :  { %v1264_v17 = vadd.f32 %v1263_v40, %v1256_v44 }
0x1de5   :  { %v1269_v9 = vpop.permute.xlu1 %1268 }
0x1de6   :  { %v1271_v45 = vmul.f32 %v1269_v9, %v2218_v41  ;;  %v1303_v41 = vmul.f32 %v1301_v52, %v2303_v27 }
0x1de8   :  { %v1272_v63 = vadd.f32 %v1271_v45, %v1264_v17 }
0x1de9   :  { %v1277_v43 = vpop.permute.xlu1 %1276 }
0x1dea   :  { %v1279_v46 = vmul.f32 %v1277_v43, %v2235_v62 }
0x1dec   :  { %v1280_v5 = vadd.f32 %v1279_v46, %v1272_v63 }
0x1ded   :  { %v1285_v47 = vpop.permute.xlu1 %1284 }
0x1dee   :  { %v1287_v42 = vmul.f32 %v1285_v47, %v2252_v28  ;;  %v1312_v28 = vpop.permute.xlu0 %1311 }
0x1df0   :  { %v1288_v20 = vadd.f32 %v1287_v42, %v1280_v5 }
0x1df1   :  { %v1293_v48 = vpop.permute.xlu1 %1292 }
0x1df2   :  { %v1295_v50 = vmul.f32 %v1293_v48, %v2265_v49  ;;  %v1898_v49 = vld [vmem:[%s2383_s6] ss:$0 sm:$0xff] }
0x1df4   :  { %v1296_v51 = vadd.f32 %v1295_v50, %v1288_v20 }
0x1df6   :  { %v1304_v53 = vadd.f32 %v1303_v41, %v1296_v51 }
0x1df8   :  { %v1305_v62 = vadd.f32 %v1304_v53, %v2303_v27 }
0x1dfa   :  { %1307 = vrot.lane.b32.xlu1 %v1305_v62, %s1926_s18 }
0x1e6c   :  { %v1308_v54 = vpop.permute.xlu1 %1307 }
0x1e6d   :  { %v1314_v55 = vsel %vm241_vm2, %v1308_v54, %v1312_v28 }
0x1e6e   :  { %v1315_v56 = vpack.c.bf16 %v1314_v55, %v1314_v55 }
0x1e70   :  { %1750 = vmatmul.mubr.msk.bf16.vlgmr.msra.gmra.mrb[40].mxu1 %vm1348_vm3, %v1315_v56 }
0x1f43   :  { %v1386_v57 = vpop.f32.mrb[40].mxu1 }
0x1f44   :  { %v1387_v11 = vadd.f32 %v1898_v49, %v1386_v57  ;;  %v1751_v58 = vpop.f32.mrb[41].mxu1 }
0x1f45   :  { %v1389_v59 = vpop.f32.mrb[42].mxu1 }
0x1f46   :  { %1890 = vtanh.f32 %v1387_v11  ;;  %v1752_v60 = vpop.f32.mrb[43].mxu1  ;;  %v1553_v61 = vmul.f32 -1.442695, %v1387_v11 }
0x1f48   :  { %1892 = vpow2.f32 %v1553_v61 }
0x1f50   :  { %v1891_v27 = vpop.eup %1890 }
0x1f51   :  { %1401 = vrot.lane.b32.xlu1 %v1891_v27, %s1925_s15 }
0x1f52   :  { %v1893_v0 = vpop.eup %1892 }
0x1f53   :  { %v1395_v19 = vadd.f32 1.0, %v1893_v0 }
0x1f55   :  { %1894 = vrcp.f32 %v1395_v19 }
0x1f5f   :  { %v1895_v21 = vpop.eup %1894 }
0x1f60   :  { %v1399_v6 = vmul.f32 %v1895_v21, %v2290_v18 }
0x1fc3   :  { %v1402_v1 = vpop.permute.xlu1 %1401 }
0x1fc4   :  { %v1404_v4 = vmul.f32 %v1895_v21, %v1402_v1 }
0x1fc6   :  { %1406 = vrot.lane.b32.xlu0 %v1404_v4, %s1926_s18 }
0x2038   :  { %v1407_v8 = vpop.permute.xlu0 %1406 }
0x2039   :  { %v1409_v7 = vadd.f32 %v1407_v8, %v1399_v6 }
0x203b   :  { %1896 = vtanh.f32 %v1409_v7 }
0x2045   :  { %v1897_v16 = vpop.eup %1896 }
0x2046   :  { %1412 = vrot.lane.b32.xlu1 %v1897_v16, %s1925_s15 }
0x20b8   :  { %v1413_v12 = vpop.permute.xlu1 %1412 }
0x20b9   :  { %v1415_v18 = vmul.f32 %v1895_v21, %v1413_v12 }
0x20bb   :  { %v1416_v22 = vpack.c.bf16 %v1415_v18, %v1415_v18 }
0x20bd   :  { %1429 = vrot.lane.b32.xlu0 %v1416_v22, %s1926_s18 }
0x212f   :  { %v1430_v13 = vpop.permute.xlu0 %1429 }
0x2130   :  { %1758 = vmatmul.mubr.msk.bf16.vlgmr.msra.gmra.mrb[40].mxu0 %vm241_vm2, %v1430_v13 }
0x2203   :  { %v1480_v24 = vpop.f32.mrb[40].mxu0 }
0x2204   :  { %v1481_v2 = vadd.f32 %v1554_v23, %v1480_v24  ;;  %v1759_v15 = vpop.f32.mrb[41].mxu0 }
0x2205   :  { %v1483_v25 = vpop.f32.mrb[42].mxu0 }
0x2206   :  { %v1760_v26 = vpop.f32.mrb[43].mxu0  ;;  %1487 = vst.msk [vmem:[#allocation3] sm:$0xff] %vm1486_vm4, %v1481_v2 }
0x2207   :  { %1910 = shalt.err (!%p1907_p4)
}
0x2208   :  { %s1911_s10 = scalar_lea.hbm %s2390_s13, 128 }
0x2209   :  { %p1912_p5 = scmp.ne.s32.totalorder %s2390_s13, %s1911_s10  ;;  %p1915_p6 = scmp.lt.u32.totalorder %s1911_s10, %s2390_s13 }
0x220b   :  { %p1917_p7 = pnand %p1915_p6, %p1912_p5 }
0x220d   :  { %1920 = shalt.err (!%p1917_p7)
}
0x220e   :  { %1497 = dma.vmem_to_hbm [thread:$0]  %s1495_s9, 128, %s2390_s13, [#allocation4]  }
0x220f   :  { %1921 = dma.done.wait [#allocation4], 128  }
0x2210   :  { %1922 = vsyncadd [#allocation4], 4294967168 }
0x2211   :  { %1501 = vsyncpa [#allocation4], 1 }

</bundles_post_ra>
